<compile_context>
chip_gen: v5e
topology: v5e:2x2
jax: 0.10.0
libtpu: 0.0.40
codegen_flags: <defaults>
</compile_context>

<pallas_src>
import jax
import jax.numpy as jnp
from jax.experimental import pallas as pl
from jax.experimental.pallas import tpu as pltpu


def _make_conv_relu_kernel(KH, KW, SH, SW, OH, OW, Cin, Cout):
    """Builds the per-image kernel body (all dims are compile-time constants)."""

    def kernel(x_ref, w_ref, b_ref, o_ref):
        # x_ref: [1, Hp, Wp, Cin]   padded input, channels-last
        # w_ref: [KH*KW, Cin, Cout] one [Cin, Cout] matmul operand per tap
        # b_ref: [1, Cout]
        # o_ref: [1, OH, OW, Cout]
        x = x_ref[0]                                   # [Hp, Wp, Cin]
        acc = jnp.zeros((OH * OW, Cout), jnp.float32)
        for kh in range(KH):
            for kw in range(KW):
                win = x[kh:kh + SH * (OH - 1) + 1:SH,
                        kw:kw + SW * (OW - 1) + 1:SW, :]        # [OH, OW, Cin]
                acc = acc + jnp.dot(win.reshape(OH * OW, Cin),
                                    w_ref[kh * KW + kw],
                                    preferred_element_type=jnp.float32)
        out = jnp.maximum(acc + b_ref[...], 0.0)                # bias + ReLU
        o_ref[...] = out.reshape(1, OH, OW, Cout).astype(o_ref.dtype)

    return kernel


def prepare_conv_params(weight, bias):
    """One-time weight re-layout (hoisted out of the forward hot path).

    weight: [Cout, Cin, KH, KW] (PyTorch OIHW) -> [KH*KW, Cin, Cout]
    bias  : [Cout]              -> [1, Cout]
    """
    Cout, Cin, KH, KW = weight.shape
    w_kcc = jnp.transpose(weight, (2, 3, 1, 0)).reshape(KH * KW, Cin, Cout)
    return w_kcc, bias.reshape(1, Cout), (Cout, Cin, KH, KW)


def basic_conv2d_forward(x_nchw, prepared, *, stride=(1, 1), padding=(0, 0)):
    """x_nchw: [N, Cin, H, W] float32. Returns [N, Cout, OH, OW] (NCHW)."""
    w_kcc, b_row, (Cout, Cin, KH, KW) = prepared
    N, Cin_x, H, W = x_nchw.shape
    assert Cin_x == Cin
    SH, SW = stride
    PH, PW = padding
    OH = (H + 2 * PH - KH) // SH + 1
    OW = (W + 2 * PW - KW) // SW + 1
    Hp, Wp = H + 2 * PH, W + 2 * PW

    # Channels-last + spatial zero-padding (cheap XLA glue outside the kernel).
    x_nhwc = jnp.transpose(x_nchw, (0, 2, 3, 1))
    x_pad = jnp.pad(x_nhwc, ((0, 0), (PH, PH), (PW, PW), (0, 0)))

    # Realistic VMEM budget: double-buffered blocks + headroom, <= 32 MiB so it
    # is valid on v7x (64 MiB physical) as well as v5e/v6e.
    itemsize = 4
    blk_bytes = (Hp * Wp * Cin + KH * KW * Cin * Cout + Cout
                 + OH * OW * Cout) * itemsize
    vmem_limit = int(min(32 * 1024 * 1024, max(8 * 1024 * 1024, 8 * blk_bytes)))

    kernel = _make_conv_relu_kernel(KH, KW, SH, SW, OH, OW, Cin, Cout)

    out_nhwc = pl.pallas_call(
        kernel,
        out_shape=jax.ShapeDtypeStruct((N, OH, OW, Cout), jnp.float32),
        grid=(N,),
        in_specs=[
            pl.BlockSpec((1, Hp, Wp, Cin), lambda n: (n, 0, 0, 0)),
            pl.BlockSpec((KH * KW, Cin, Cout), lambda n: (0, 0, 0)),
            pl.BlockSpec((1, Cout), lambda n: (0, 0)),
        ],
        out_specs=pl.BlockSpec((1, OH, OW, Cout), lambda n: (n, 0, 0, 0)),
        compiler_params=pltpu.CompilerParams(
            dimension_semantics=("parallel",),
            vmem_limit_bytes=vmem_limit,
        ),
    )(x_pad, w_kcc, b_row)

    # Back to PyTorch's NCHW.
    return jnp.transpose(out_nhwc, (0, 3, 1, 2))


def ref_forward(x, weight, bias, stride, padding):
    """Pure-JAX reference matching the PyTorch forward (Conv2d + ReLU)."""
    out = jax.lax.conv_general_dilated(
        x, weight, window_strides=stride,
        padding=((padding[0], padding[0]), (padding[1], padding[1])),
        dimension_numbers=("NCHW", "OIHW", "NCHW"))
    return jax.nn.relu(out + bias[None, :, None, None])


if __name__ == "__main__":
    # Small shapes consistent with BasicConv2d usage: 3x3 conv, stride 1, pad 1.
    N, Cin, H, W = 2, 4, 16, 16
    Cout, KH, KW = 32, 3, 3
    stride, padding = (1, 1), (1, 1)

    key = jax.random.PRNGKey(0)
    kx, kw, kb = jax.random.split(key, 3)
    x = jax.random.normal(kx, (N, Cin, H, W), jnp.float32)
    weight = 0.1 * jax.random.normal(kw, (Cout, Cin, KH, KW), jnp.float32)
    bias = 0.1 * jax.random.normal(kb, (Cout,), jnp.float32)

    prepared = prepare_conv_params(weight, bias)   # hoisted, one-time layout
    out = jax.block_until_ready(
        basic_conv2d_forward(x, prepared, stride=stride, padding=padding))

    ref = jax.block_until_ready(ref_forward(x, weight, bias, stride, padding))
    assert out.shape == ref.shape == (N, Cout, H, W)
    if not jnp.allclose(out, ref, rtol=1e-4, atol=1e-4):
        raise AssertionError("Pallas kernel does not match JAX reference")

    print("KERNEL_OK")
</pallas_src>

<mosaic_0001>
module attributes {stable_mosaic.version = 11 : i64} {
  func.func @kernel(%arg0: i32, %arg1: memref<1x18x18x4xf32, #tpu.memory_space<vmem>>, %arg2: memref<9x4x32xf32, #tpu.memory_space<vmem>>, %arg3: memref<1x32xf32, #tpu.memory_space<vmem>>, %arg4: memref<1x16x16x32xf32, #tpu.memory_space<vmem>>) attributes {dimension_semantics = [#tpu.dimension_semantics<parallel>], iteration_bounds = array<i64: 2>, scalar_prefetch = 0 : i64, scratch_operands = 0 : i64, tpu.core_type = #tpu.core_type<tc>, window_params = [{transform_indices = @transform_0, window_bounds = array<i64: 1, 18, 18, 4>}, {pipeline_mode = #tpu.pipeline_mode<synchronous>, transform_indices = @transform_1, window_bounds = array<i64: 9, 4, 32>}, {pipeline_mode = #tpu.pipeline_mode<synchronous>, transform_indices = @transform_2, window_bounds = array<i64: 1, 32>}, {transform_indices = @transform_3, window_bounds = array<i64: 1, 16, 16, 32>}]} {
    %c0 = arith.constant 0 : index
    %c0_0 = arith.constant 0 : index
    %c0_1 = arith.constant 0 : index
    %c0_2 = arith.constant 0 : index
    %0 = vector.load %arg1[%c0, %c0_0, %c0_1, %c0_2] : memref<1x18x18x4xf32, #tpu.memory_space<vmem>>, vector<1x18x18x4xf32>
    %1 = vector.shape_cast %0 : vector<1x18x18x4xf32> to vector<18x18x4xf32>
    %cst = arith.constant 0.000000e+00 : f32
    %2 = vector.broadcast %cst : f32 to vector<256x32xf32>
    %3 = vector.extract_strided_slice %1 {offsets = [0, 0, 0], sizes = [16, 16, 4], strides = [1, 1, 1]} : vector<18x18x4xf32> to vector<16x16x4xf32>
    %4 = vector.shape_cast %3 : vector<16x16x4xf32> to vector<256x4xf32>
    %c0_3 = arith.constant 0 : index
    %c0_4 = arith.constant 0 : index
    %c0_5 = arith.constant 0 : index
    %5 = vector.load %arg2[%c0_3, %c0_4, %c0_5] : memref<9x4x32xf32, #tpu.memory_space<vmem>>, vector<1x4x32xf32>
    %6 = vector.shape_cast %5 : vector<1x4x32xf32> to vector<4x32xf32>
    %cst_6 = arith.constant dense<0.000000e+00> : vector<256x32xf32>
    %7 = tpu.matmul %4, %6, %cst_6 {dimension_numbers = #tpu.dot_dimension_numbers<[1], [0], [0], [1], [0, 0, 1, 1], [], []>} : vector<256x4xf32>, vector<4x32xf32>, vector<256x32xf32> -> vector<256x32xf32>
    %8 = arith.addf %2, %7 : vector<256x32xf32>
    %9 = vector.extract_strided_slice %1 {offsets = [0, 1, 0], sizes = [16, 16, 4], strides = [1, 1, 1]} : vector<18x18x4xf32> to vector<16x16x4xf32>
    %10 = vector.shape_cast %9 : vector<16x16x4xf32> to vector<256x4xf32>
    %c1 = arith.constant 1 : index
    %c0_7 = arith.constant 0 : index
    %c0_8 = arith.constant 0 : index
    %11 = vector.load %arg2[%c1, %c0_7, %c0_8] : memref<9x4x32xf32, #tpu.memory_space<vmem>>, vector<1x4x32xf32>
    %12 = vector.shape_cast %11 : vector<1x4x32xf32> to vector<4x32xf32>
    %cst_9 = arith.constant dense<0.000000e+00> : vector<256x32xf32>
    %13 = tpu.matmul %10, %12, %cst_9 {dimension_numbers = #tpu.dot_dimension_numbers<[1], [0], [0], [1], [0, 0, 1, 1], [], []>} : vector<256x4xf32>, vector<4x32xf32>, vector<256x32xf32> -> vector<256x32xf32>
    %14 = arith.addf %8, %13 : vector<256x32xf32>
    %15 = vector.extract_strided_slice %1 {offsets = [0, 2, 0], sizes = [16, 16, 4], strides = [1, 1, 1]} : vector<18x18x4xf32> to vector<16x16x4xf32>
    %16 = vector.shape_cast %15 : vector<16x16x4xf32> to vector<256x4xf32>
    %c2 = arith.constant 2 : index
    %c0_10 = arith.constant 0 : index
    %c0_11 = arith.constant 0 : index
    %17 = vector.load %arg2[%c2, %c0_10, %c0_11] : memref<9x4x32xf32, #tpu.memory_space<vmem>>, vector<1x4x32xf32>
    %18 = vector.shape_cast %17 : vector<1x4x32xf32> to vector<4x32xf32>
    %cst_12 = arith.constant dense<0.000000e+00> : vector<256x32xf32>
    %19 = tpu.matmul %16, %18, %cst_12 {dimension_numbers = #tpu.dot_dimension_numbers<[1], [0], [0], [1], [0, 0, 1, 1], [], []>} : vector<256x4xf32>, vector<4x32xf32>, vector<256x32xf32> -> vector<256x32xf32>
    %20 = arith.addf %14, %19 : vector<256x32xf32>
    %21 = vector.extract_strided_slice %1 {offsets = [1, 0, 0], sizes = [16, 16, 4], strides = [1, 1, 1]} : vector<18x18x4xf32> to vector<16x16x4xf32>
    %22 = vector.shape_cast %21 : vector<16x16x4xf32> to vector<256x4xf32>
    %c3 = arith.constant 3 : index
    %c0_13 = arith.constant 0 : index
    %c0_14 = arith.constant 0 : index
    %23 = vector.load %arg2[%c3, %c0_13, %c0_14] : memref<9x4x32xf32, #tpu.memory_space<vmem>>, vector<1x4x32xf32>
    %24 = vector.shape_cast %23 : vector<1x4x32xf32> to vector<4x32xf32>
    %cst_15 = arith.constant dense<0.000000e+00> : vector<256x32xf32>
    %25 = tpu.matmul %22, %24, %cst_15 {dimension_numbers = #tpu.dot_dimension_numbers<[1], [0], [0], [1], [0, 0, 1, 1], [], []>} : vector<256x4xf32>, vector<4x32xf32>, vector<256x32xf32> -> vector<256x32xf32>
    %26 = arith.addf %20, %25 : vector<256x32xf32>
    %27 = vector.extract_strided_slice %1 {offsets = [1, 1, 0], sizes = [16, 16, 4], strides = [1, 1, 1]} : vector<18x18x4xf32> to vector<16x16x4xf32>
    %28 = vector.shape_cast %27 : vector<16x16x4xf32> to vector<256x4xf32>
    %c4 = arith.constant 4 : index
    %c0_16 = arith.constant 0 : index
    %c0_17 = arith.constant 0 : index
    %29 = vector.load %arg2[%c4, %c0_16, %c0_17] : memref<9x4x32xf32, #tpu.memory_space<vmem>>, vector<1x4x32xf32>
    %30 = vector.shape_cast %29 : vector<1x4x32xf32> to vector<4x32xf32>
    %cst_18 = arith.constant dense<0.000000e+00> : vector<256x32xf32>
    %31 = tpu.matmul %28, %30, %cst_18 {dimension_numbers = #tpu.dot_dimension_numbers<[1], [0], [0], [1], [0, 0, 1, 1], [], []>} : vector<256x4xf32>, vector<4x32xf32>, vector<256x32xf32> -> vector<256x32xf32>
    %32 = arith.addf %26, %31 : vector<256x32xf32>
    %33 = vector.extract_strided_slice %1 {offsets = [1, 2, 0], sizes = [16, 16, 4], strides = [1, 1, 1]} : vector<18x18x4xf32> to vector<16x16x4xf32>
    %34 = vector.shape_cast %33 : vector<16x16x4xf32> to vector<256x4xf32>
    %c5 = arith.constant 5 : index
    %c0_19 = arith.constant 0 : index
    %c0_20 = arith.constant 0 : index
    %35 = vector.load %arg2[%c5, %c0_19, %c0_20] : memref<9x4x32xf32, #tpu.memory_space<vmem>>, vector<1x4x32xf32>
    %36 = vector.shape_cast %35 : vector<1x4x32xf32> to vector<4x32xf32>
    %cst_21 = arith.constant dense<0.000000e+00> : vector<256x32xf32>
    %37 = tpu.matmul %34, %36, %cst_21 {dimension_numbers = #tpu.dot_dimension_numbers<[1], [0], [0], [1], [0, 0, 1, 1], [], []>} : vector<256x4xf32>, vector<4x32xf32>, vector<256x32xf32> -> vector<256x32xf32>
    %38 = arith.addf %32, %37 : vector<256x32xf32>
    %39 = vector.extract_strided_slice %1 {offsets = [2, 0, 0], sizes = [16, 16, 4], strides = [1, 1, 1]} : vector<18x18x4xf32> to vector<16x16x4xf32>
    %40 = vector.shape_cast %39 : vector<16x16x4xf32> to vector<256x4xf32>
    %c6 = arith.constant 6 : index
    %c0_22 = arith.constant 0 : index
    %c0_23 = arith.constant 0 : index
    %41 = vector.load %arg2[%c6, %c0_22, %c0_23] : memref<9x4x32xf32, #tpu.memory_space<vmem>>, vector<1x4x32xf32>
    %42 = vector.shape_cast %41 : vector<1x4x32xf32> to vector<4x32xf32>
    %cst_24 = arith.constant dense<0.000000e+00> : vector<256x32xf32>
    %43 = tpu.matmul %40, %42, %cst_24 {dimension_numbers = #tpu.dot_dimension_numbers<[1], [0], [0], [1], [0, 0, 1, 1], [], []>} : vector<256x4xf32>, vector<4x32xf32>, vector<256x32xf32> -> vector<256x32xf32>
    %44 = arith.addf %38, %43 : vector<256x32xf32>
    %45 = vector.extract_strided_slice %1 {offsets = [2, 1, 0], sizes = [16, 16, 4], strides = [1, 1, 1]} : vector<18x18x4xf32> to vector<16x16x4xf32>
    %46 = vector.shape_cast %45 : vector<16x16x4xf32> to vector<256x4xf32>
    %c7 = arith.constant 7 : index
    %c0_25 = arith.constant 0 : index
    %c0_26 = arith.constant 0 : index
    %47 = vector.load %arg2[%c7, %c0_25, %c0_26] : memref<9x4x32xf32, #tpu.memory_space<vmem>>, vector<1x4x32xf32>
    %48 = vector.shape_cast %47 : vector<1x4x32xf32> to vector<4x32xf32>
    %cst_27 = arith.constant dense<0.000000e+00> : vector<256x32xf32>
    %49 = tpu.matmul %46, %48, %cst_27 {dimension_numbers = #tpu.dot_dimension_numbers<[1], [0], [0], [1], [0, 0, 1, 1], [], []>} : vector<256x4xf32>, vector<4x32xf32>, vector<256x32xf32> -> vector<256x32xf32>
    %50 = arith.addf %44, %49 : vector<256x32xf32>
    %51 = vector.extract_strided_slice %1 {offsets = [2, 2, 0], sizes = [16, 16, 4], strides = [1, 1, 1]} : vector<18x18x4xf32> to vector<16x16x4xf32>
    %52 = vector.shape_cast %51 : vector<16x16x4xf32> to vector<256x4xf32>
    %c8 = arith.constant 8 : index
    %c0_28 = arith.constant 0 : index
    %c0_29 = arith.constant 0 : index
    %53 = vector.load %arg2[%c8, %c0_28, %c0_29] : memref<9x4x32xf32, #tpu.memory_space<vmem>>, vector<1x4x32xf32>
    %54 = vector.shape_cast %53 : vector<1x4x32xf32> to vector<4x32xf32>
    %cst_30 = arith.constant dense<0.000000e+00> : vector<256x32xf32>
    %55 = tpu.matmul %52, %54, %cst_30 {dimension_numbers = #tpu.dot_dimension_numbers<[1], [0], [0], [1], [0, 0, 1, 1], [], []>} : vector<256x4xf32>, vector<4x32xf32>, vector<256x32xf32> -> vector<256x32xf32>
    %56 = arith.addf %50, %55 : vector<256x32xf32>
    %c0_31 = arith.constant 0 : index
    %c0_32 = arith.constant 0 : index
    %57 = vector.load %arg3[%c0_31, %c0_32] : memref<1x32xf32, #tpu.memory_space<vmem>>, vector<1x32xf32>
    %58 = vector.broadcast %57 : vector<1x32xf32> to vector<256x32xf32>
    %59 = arith.addf %56, %58 : vector<256x32xf32>
    %cst_33 = arith.constant 0.000000e+00 : f32
    %60 = vector.broadcast %cst_33 : f32 to vector<256x32xf32>
    %61 = arith.maximumf %59, %60 : vector<256x32xf32>
    %62 = vector.shape_cast %61 : vector<256x32xf32> to vector<1x16x16x32xf32>
    %c0_34 = arith.constant 0 : index
    %c0_35 = arith.constant 0 : index
    %c0_36 = arith.constant 0 : index
    %c0_37 = arith.constant 0 : index
    %63 = vector.load %arg4[%c0_34, %c0_35, %c0_36, %c0_37] : memref<1x16x16x32xf32, #tpu.memory_space<vmem>>, vector<1x16x16x32xf32>
    tpu.vector_store %arg4[%c0_34, %c0_35, %c0_36, %c0_37], %62 {strides = array<i32>} : memref<1x16x16x32xf32, #tpu.memory_space<vmem>>, vector<1x16x16x32xf32>,
    return
  }
  func.func @transform_0(%arg0: i32) -> (i32, i32, i32, i32) {
    %c0_i32 = arith.constant 0 : i32
    %c0_i32_0 = arith.constant 0 : i32
    %c0_i32_1 = arith.constant 0 : i32
    %c0_i32_2 = arith.constant 0 : i32
    return %arg0, %c0_i32, %c0_i32_0, %c0_i32_1 : i32, i32, i32, i32
  }
  func.func @transform_1(%arg0: i32) -> (i32, i32, i32) {
    %c0_i32 = arith.constant 0 : i32
    %c0_i32_0 = arith.constant 0 : i32
    %c0_i32_1 = arith.constant 0 : i32
    %c0_i32_2 = arith.constant 0 : i32
    return %c0_i32, %c0_i32_0, %c0_i32_1 : i32, i32, i32
  }
  func.func @transform_2(%arg0: i32) -> (i32, i32) {
    %c0_i32 = arith.constant 0 : i32
    %c0_i32_0 = arith.constant 0 : i32
    %c0_i32_1 = arith.constant 0 : i32
    return %c0_i32, %c0_i32_0 : i32, i32
  }
  func.func @transform_3(%arg0: i32) -> (i32, i32, i32, i32) {
    %c0_i32 = arith.constant 0 : i32
    %c0_i32_0 = arith.constant 0 : i32
    %c0_i32_1 = arith.constant 0 : i32
    %c0_i32_2 = arith.constant 0 : i32
    return %arg0, %c0_i32, %c0_i32_0, %c0_i32_1 : i32, i32, i32, i32
  }
}

</mosaic_0001>

<bundles_post_ra>
// kernel: tpu_custom_call.1
= control target key start
LH: loop header
LB: loop body
LE: loop exit
PB: predicated region body
PF: predicated region fallthrough
CT: control target
= control target key end

     0   :  { %8 = vsyncpa [#allocation3], 0  ;;  %s4056_s0 = inlined_call_operand.vmem [shape: f32[2,18,18,4], index: 0, kind: input, shape index: {}]   ;;  %s4057_s1 = inlined_call_operand.vmem [shape: f32[9,4,32], index: 1, kind: input, shape index: {}]   ;;  %s4058_s2 = inlined_call_operand.vmem [shape: f32[1,32], index: 2, kind: input, shape index: {}]   ;;  %s4059_s3 = inlined_call_operand.hbm [shape: f32[2,16,16,32], index: 3, kind: output, shape index: {}]  }
   0x1   :  { %10 = vsyncpa [#allocation3 + $0x1], 0  ;;  %s2614_s12 = smov 0   ;;  %s2616_s13 = smov 0  }
   0x2   :  { %s2618_s14 = smov 0   ;;  %s2620_s15 = smov 0  }
   0x3 LB: > { %s2635_s16 = sadd.s32 4294967295, %s2590_s15   ;;  %s2141_s17 = sadd.s32 4294967294, %s2590_s15   ;;  %s2590_s15 = sphi %s2620_s15, %s4278_s15   ;;  %s2586_s14 = sphi %s2618_s14, %s4277_s14   ;;  %s2582_s13 = sphi %s2616_s13, %s4276_s13   ;;  %s2578_s12 = sphi %s2614_s12, %s4275_s12  }
   0x4   : > { %s2639_s18 = sadd.s32 1, %s2590_s15   ;;  %s91_s19 = sadd.s32 1, %s2586_s14 }
   0x5   : > { %s88_s20 = ssub.s32 %s2590_s15, %s2639_s18  ;;  %p101_p0 = scmp.ne.s32.totalorder %s2586_s14, %s2582_s13 }
   0x6   : > { %p89_p1 = scmp.eq.s32.totalorder %s88_s20, 0  ;;  %p102_p2 = scmp.eq.s32.totalorder %s2635_s16, 1 }
   0x7   : > { %p107_p3 = scmp.ne.s32.totalorder %s2582_s13, %s2578_s12  ;;  %p108_p4 = scmp.eq.s32.totalorder %s2141_s17, 1 }
   0x8   : > { %s2650_s21 = scalar_select %p89_p1, %s2586_s14, %s91_s19  }
   0x9   : > { %p2652_p5 = por %p102_p2, %p101_p0  ;;  %p2656_p6 = por %p108_p4, %p107_p3 }
   0xa   : > { %p2144_p7 = scmp.ge.s32.totalorder %s2590_s15, 1  ;;  %p140_p8 = scmp.lt.s32.totalorder %s2590_s15, 3 }
   0xc   : > { %p141_p9 = pnand %p2144_p7, %p140_p8 }
   0xe   : > { %144 = sbr.rel (%p141_p9) target bundleno = 745 (0x2e9), region = 32 }
  0x13   : > { %v2147_v0 = vld [vmem:[%s4057_s1 + $0x4] sm:$0xf]  ;;  %vm420_vm0 = vcmask 1043456   ;;  %p164_p10 = scmp.lt.s32.totalorder %s2635_s16, 1  ;;  %v2214_v1 = vld [vmem:[%s4057_s1 + $0x8] sm:$0xf] }
  0x14   : > { %2458 = vmatpush.msk.msra.mxu1 %vm420_vm0, %v2147_v0  ;;  %2459 = vmatpush.msk.msra.mxu2 %vm420_vm0, %v2147_v0  ;;  %v2248_v2 = vld [vmem:[%s4057_s1 + $0xc] sm:$0xf]  ;;  %v223_v3 = vld [vmem:[%s4057_s1] sm:$0xf]  ;;  %v2282_v4 = vld [vmem:[%s4057_s1 + $0x10] sm:$0xf] }
  0x15   : > { %s165_s5 = scalar_select %p164_p10, %s2635_s16, 1  ;;  %2460 = vmatpush.msk.msra.mxu3 %vm420_vm0, %v2147_v0  ;;  %2148 = vmatpush.msk.msra.mxu0 %vm420_vm0, %v2147_v0  ;;  %vm272_vm1 = vcmask 1046528   ;;  %vm355_vm2 = vcmask 31744   ;;  %vm717_vm3 = vcmask 1045504   ;;  %vm2030_vm4 = vcmask 261120  }
  0x16   : > { %2215 = vmatpush.msk.msrb.mxu2 %vm420_vm0, %v2214_v1  ;;  %2181 = vmatpush.msk.msrb.mxu1 %vm420_vm0, %v223_v3  ;;  %s161_s29 = sand.u32 1, %s2582_s13   ;;  %s2457_s7 = sshll.u32 %s2635_s16, 8 }
  0x17   : > { %2249 = vmatpush.msk.msrb.mxu3 %vm420_vm0, %v2248_v2  ;;  %s2461_s8 = smul.u32 432, %s165_s5  ;;  %2283 = vmatpush.msk.msrb.mxu0 %vm420_vm0, %v2282_v4  ;;  %s2145_s5 = sshll.u32 %s161_s29, 8 }
  0x18   : > { %s3781_s6 = scalar_lea.vmem [#allocation2], %s2145_s5  ;;  %s2075_s10 = scalar_lea.hbm %s4059_s3, %s2457_s7 }
  0x19   : > { %s2690_s11 = scalar_lea.vmem %s4056_s0, %s2461_s8  ;;  %s2078_s17 = sshll.u32 %s2075_s10, 4  ;;  %s2079_s17 = int_to_ptr.hbm [resolvable:$true] %s2078_s17 }
  0x1a   : > { %v2693_v5 = vld [vmem:[%s2690_s11 + $0x60] sm:$0xff]  ;;  %v2696_v6 = vld [vmem:[%s2690_s11 + $0x68] sm:$0xff]  ;;  %v2717_v17 = vld [vmem:[%s2690_s11 + $0x70] sm:$0x3]  ;;  %s2064_s16 = scalar_lea.sflag [#allocation3], %s161_s29  ;;  %s2542_s19 = sshra.s32 %s2079_s17, 4  ;;  %s2543_s19 = int_to_ptr.hbm [resolvable:$true] %s2542_s19 }
  0x1b   : > { %v2699_v7 = vld [vmem:[%s2690_s11 + $0xc0] sm:$0xff]  ;;  %v293_v8 = vrot.slane %v2693_v5, 1  ;;  %v294_v9 = vrot.slane %v2696_v6, 1  ;;  %v2704_v10 = vld [vmem:[%s2690_s11 + $0xc8] sm:$0xff]  ;;  %v2726_v20 = vld [vmem:[%s2690_s11 + $0xd0] sm:$0x3]  ;;  %p2549_p0 = scmp.lt.s32.totalorder %s2543_s19, %s4059_s3 }
  0x1c   : > { %v313_v11 = vrot.slane %v2699_v7, 1  ;;  %v2708_v12 = vld [vmem:[%s2690_s11 + $0x120] sm:$0xff]  ;;  %v2711_v13 = vld [vmem:[%s2690_s11 + $0x128] sm:$0xff]  ;;  %v314_v14 = vrot.slane %v2704_v10, 1  ;;  %v2742_v26 = vld [vmem:[%s2690_s11 + $0x130] sm:$0x3] }
  0x1d   : > { %4137 = vst [vmem:[#allocation5_spill] sm:$0xff] %v2708_v12  ;;  %v333_v15 = vrot.slane %v2708_v12, 1  ;;  %v334_v16 = vrot.slane %v2711_v13, 1  ;;  %v2720_v18 = vld [vmem:[%s2690_s11] sm:$0xff]  ;;  %v2723_v19 = vsel %vm272_vm1, %v293_v8, %v294_v9  ;;  %v2729_v21 = vld [vmem:[%s2690_s11 + $0x8] sm:$0xff]  ;;  %v296_v27 = vrot.slane %v2717_v17, 1 }
  0x1e   : > { %4138 = vst [vmem:[#allocation6_spill] sm:$0xff] %v2711_v13  ;;  %v273_v22 = vrot.slane %v2720_v18, 1  ;;  %2157 = vmatmul.msk.f32.vlgmr.msra.gmra.mxu1 %vm355_vm2, %v2723_v19  ;;  %v2735_v23 = vsel %vm272_vm1, %v313_v11, %v314_v14  ;;  %v274_v25 = vrot.slane %v2729_v21, 1  ;;  %v2750_v28 = vld [vmem:[%s2690_s11 + $0x10] sm:$0x3]  ;;  %v316_v29 = vrot.slane %v2726_v20, 1 }
  0x1f   : > { %4139 = vst [vmem:[#allocation7_spill] sm:$0xff] %v2735_v23  ;;  %v2738_v24 = vsel %vm272_vm1, %v333_v15, %v334_v16  ;;  %2165 = vmatmul.msk.f32.vlgmr.msra.gmra.mxu2 %vm355_vm2, %v2735_v23  ;;  %v336_v31 = vrot.slane %v2742_v26, 1  ;;  %v276_v32 = vrot.slane %v2750_v28, 1  ;;  %v2758_v33 = vsel %vm272_vm1, %v294_v9, %v296_v27  ;;  %v2767_v36 = vld [vmem:[%s2690_s11 + $0x78] sm:$0xff]  ;;  %v2770_v37 = vld [vmem:[%s2690_s11 + $0x80] sm:$0xff]  ;;  %v2852_v4 = vld [vmem:[%s2690_s11 + $0x90] sm:$0xff] }
  0x20   : > { %4140 = vst [vmem:[#allocation8_spill] sm:$0xff] %v2738_v24  ;;  %2173 = vmatmul.msk.f32.vlgmr.msra.gmra.mxu3 %vm355_vm2, %v2738_v24  ;;  %v275_v30 = vsel %vm272_vm1, %v273_v22, %v274_v25  ;;  %v2761_v34 = vsel %vm272_vm1, %v314_v14, %v316_v29  ;;  %v2773_v38 = vld [vmem:[%s2690_s11 + $0xd8] sm:$0xff]  ;;  %v2776_v39 = vld [vmem:[%s2690_s11 + $0xe0] sm:$0xff]  ;;  %v298_v43 = vrot.slane %v2767_v36, 1  ;;  %v299_v44 = vrot.slane %v2770_v37, 1  ;;  %v2858_v9 = vld [vmem:[%s2690_s11 + $0xf0] sm:$0xff] }
  0x21   : > { %4141 = vst [vmem:[#allocation9_spill] sm:$0xff] %v2742_v26  ;;  %2149 = vmatmul.msk.f32.vlgmr.msra.gmra.mxu0 %vm355_vm2, %v275_v30  ;;  %v2764_v35 = vsel %vm272_vm1, %v334_v16, %v336_v31  ;;  %v2779_v40 = vld [vmem:[%s2690_s11 + $0x138] sm:$0xff]  ;;  %v2782_v41 = vld [vmem:[%s2690_s11 + $0x140] sm:$0xff]  ;;  %v277_v42 = vsel %vm272_vm1, %v274_v25, %v276_v32  ;;  %v318_v47 = vrot.slane %v2773_v38, 1  ;;  %v319_v48 = vrot.slane %v2776_v39, 1  ;;  %v2864_v14 = vld [vmem:[%s2690_s11 + $0x150] sm:$0xff] }
  0x22   : > { %4142 = vst [vmem:[#allocation10_spill] sm:$0xff] %v2758_v33  ;;  %v2794_v45 = vld [vmem:[%s2690_s11 + $0x18] sm:$0xff]  ;;  %v2797_v46 = vld [vmem:[%s2690_s11 + $0x20] sm:$0xff]  ;;  %v338_v49 = vrot.slane %v2779_v40, 1  ;;  %v339_v50 = vrot.slane %v2782_v41, 1  ;;  %v2807_v53 = vsel %vm272_vm1, %v298_v43, %v299_v44  ;;  %v303_v22 = vrot.slane %v2852_v4, 1 }
  0x23   : > { %4143 = vst [vmem:[#allocation11_spill] sm:$0xff] %v2761_v34  ;;  %v278_v51 = vrot.slane %v2794_v45, 1  ;;  %v279_v52 = vrot.slane %v2797_v46, 1  ;;  %v2810_v54 = vsel %vm272_vm1, %v318_v47, %v319_v48  ;;  %v2816_v56 = vld [vmem:[%s2690_s11 + $0x88] sm:$0x3]  ;;  %v2855_v8 = vld [vmem:[%s2690_s11 + $0x98] sm:$0xff] }
  0x24   : > { %4144 = vst [vmem:[#allocation12_spill] sm:$0xff] %v2764_v35  ;;  %v2813_v55 = vsel %vm272_vm1, %v338_v49, %v339_v50  ;;  %v2819_v57 = vld [vmem:[%s2690_s11 + $0xe8] sm:$0x3]  ;;  %v301_v60 = vrot.slane %v2816_v56, 1  ;;  %v2861_v11 = vld [vmem:[%s2690_s11 + $0xf8] sm:$0xff]  ;;  %v304_v25 = vrot.slane %v2855_v8, 1 }
  0x25   : > { %4145 = vst [vmem:[#allocation13_spill] sm:$0xff] %v2779_v40  ;;  %v2822_v58 = vld [vmem:[%s2690_s11 + $0x148] sm:$0x3]  ;;  %v2827_v59 = vsel %vm272_vm1, %v278_v51, %v279_v52  ;;  %v321_v62 = vrot.slane %v2819_v57, 1  ;;  %v2867_v15 = vld [vmem:[%s2690_s11 + $0x158] sm:$0xff]  ;;  %v2881_v27 = vld [vmem:[%s2690_s11 + $0x30] sm:$0xff] }
  0x26   : > { %4146 = vst [vmem:[#allocation14_spill] sm:$0xff] %v2782_v41  ;;  %2158 = vmatmul.msk.f32.gmra.mxu1 %vm355_vm2, %v2758_v33  ;;  %v2835_v61 = vld [vmem:[%s2690_s11 + $0x28] sm:$0x3]  ;;  %v341_v63 = vrot.slane %v2822_v58, 1  ;;  %v2843_v1 = vsel %vm272_vm1, %v299_v44, %v301_v60  ;;  %v2884_v29 = vld [vmem:[%s2690_s11 + $0x38] sm:$0xff]  ;;  %v323_v30 = vrot.slane %v2858_v9, 1  ;;  %v2895_v47 = vsel %vm272_vm1, %v303_v22, %v304_v25 }
  0x27   : > { %2166 = vmatmul.msk.f32.gmra.mxu2 %vm355_vm2, %v2761_v34  ;;  %4147 = vst [vmem:[#allocation15_spill] sm:$0xff] %v2807_v53  ;;  %v281_v0 = vrot.slane %v2835_v61, 1  ;;  %v2846_v2 = vsel %vm272_vm1, %v319_v48, %v321_v62  ;;  %v324_v31 = vrot.slane %v2861_v11, 1  ;;  %v343_v32 = vrot.slane %v2864_v14, 1  ;;  %v2898_v48 = vld [vmem:[%s2690_s11 + $0xa0] sm:$0x3] }
  0x28   : > { %2174 = vmatmul.msk.f32.gmra.mxu3 %vm355_vm2, %v2764_v35  ;;  %4148 = vst [vmem:[#allocation16_spill] sm:$0xff] %v2813_v55  ;;  %v2849_v3 = vsel %vm272_vm1, %v339_v50, %v341_v63  ;;  %v283_v43 = vrot.slane %v2881_v27, 1  ;;  %v284_v44 = vrot.slane %v2884_v29, 1  ;;  %v2907_v51 = vld [vmem:[%s2690_s11 + $0x100] sm:$0x3]  ;;  %v306_v60 = vrot.slane %v2898_v48, 1 }
  0x29   : > { %2150 = vmatmul.msk.f32.gmra.mxu0 %vm355_vm2, %v277_v42  ;;  %4149 = vst [vmem:[#allocation17_spill] sm:$0xff] %v2822_v58  ;;  %v2872_v16 = vsel %vm272_vm1, %v279_v52, %v281_v0  ;;  %v344_v42 = vrot.slane %v2867_v15, 1  ;;  %v2901_v49 = vsel %vm272_vm1, %v323_v30, %v324_v31  ;;  %v2910_v52 = vld [vmem:[%s2690_s11 + $0x160] sm:$0x3]  ;;  %v2350_v0 = vld [vmem:[%s4057_s1 + $0x18] sm:$0xf] }
  0x2a   : > { %4150 = vst [vmem:[#allocation18_spill] sm:$0xff] %v2843_v1  ;;  %v2916_v62 = vsel %vm272_vm1, %v283_v43, %v284_v44  ;;  %v2919_v63 = vld [vmem:[%s2690_s11 + $0x40] sm:$0x3]  ;;  %v2384_v22 = vld [vmem:[%s4057_s1 + $0x1c] sm:$0xf]  ;;  %v346_v43 = vrot.slane %v2910_v52, 1  ;;  %2351 = vmatpush.msk.msra.mxu2 %vm420_vm0, %v2350_v0 }
  0x2b   : > { %4151 = vst [vmem:[#allocation19_spill] sm:$0xff] %v2849_v3  ;;  %v2904_v50 = vsel %vm272_vm1, %v343_v32, %v344_v42  ;;  %v2316_v30 = vld [vmem:[%s4057_s1 + $0x14] sm:$0xf]  ;;  %v326_v32 = vrot.slane %v2907_v51, 1  ;;  %2385 = vmatpush.msk.msra.mxu3 %vm420_vm0, %v2384_v22  ;;  %v2952_v0 = vld [vmem:[%s2690_s11 + $0xa8] sm:$0xff]  ;;  %s2544_s20 = scalar_lea.hbm %s2543_s19, 256 }
  0x2c   : > { %4152 = vst [vmem:[#allocation20_spill] sm:$0xff] %v2864_v14  ;;  %2317 = vmatpush.msk.msra.mxu1 %vm420_vm0, %v2316_v30  ;;  %v2955_v22 = vld [vmem:[%s2690_s11 + $0xb0] sm:$0xff]  ;;  %v2958_v14 = vld [vmem:[%s2690_s11 + $0x108] sm:$0xff]  ;;  %v3011_v24 = vld [vmem:[%s2690_s11 + $0x118] sm:$0x3]  ;;  %p2545_p11 = scmp.ne.s32.totalorder %s2543_s19, %s2544_s20  ;;  %s2548_s26 = scalar_lea.hbm %s4059_s3, 512 }
  0x2d   : > { %4153 = vst [vmem:[#allocation21_spill] sm:$0xff] %v2867_v15  ;;  %v286_v15 = vrot.slane %v2919_v63, 1  ;;  %v2946_v58 = vsel %vm272_vm1, %v324_v31, %v326_v32  ;;  %v2961_v30 = vld [vmem:[%s2690_s11 + $0x110] sm:$0xff]  ;;  %v308_v31 = vrot.slane %v2952_v0, 1  ;;  %p2550_p1 = scmp.lt.s32.totalorder %s2548_s26, %s2544_s20 }
  0x2e   : > { %2159 = vmatmul.msk.f32.gmra.mxu1 %vm355_vm2, %v2807_v53  ;;  %4154 = vst [vmem:[#allocation22_spill] sm:$0xff] %v2895_v47  ;;  %v2967_v41 = vld [vmem:[%s2690_s11 + $0x170] sm:$0xff]  ;;  %p2546_p12 = pnand %p2545_p11, %p2652_p5 }
  0x2f   : > { %2167 = vmatmul.msk.f32.gmra.mxu2 %vm355_vm2, %v2810_v54  ;;  %4155 = vst [vmem:[#allocation23_spill] sm:$0xff] %v2904_v50  ;;  %v2984_v32 = vld [vmem:[%s2690_s11 + $0x50] sm:$0xff]  ;;  %p2551_p2 = por %p2550_p1, %p2549_p0 }
  0x30   : > { %2175 = vmatmul.msk.f32.gmra.mxu3 %vm355_vm2, %v2813_v55  ;;  %4156 = vst [vmem:[#allocation24_spill] sm:$0xff] %v2907_v51  ;;  %v349_v55 = vrot.slane %v2967_v41, 1  ;;  %v289_v40 = vrot.slane %v2984_v32, 1  ;;  %p2547_p13 = pneg %p2546_p12 }
  0x31   : > { %2151 = vmatmul.msk.f32.gmra.mxu0 %vm355_vm2, %v2827_v59  ;;  %4157 = vst [vmem:[#allocation25_spill] sm:$0xff] %v2910_v52  ;;  %v2949_v52 = vsel %vm272_vm1, %v344_v42, %v346_v43  ;;  %v309_v42 = vrot.slane %v2955_v22, 1  ;;  %v329_v43 = vrot.slane %v2961_v30, 1 }
  0x32   : > { %4159 = vst [vmem:[#allocation27_spill] sm:$0xff] %v2949_v52  ;;  %p2552_p3 = pnand %p2551_p2, %p2547_p13 }
  0x33   : > { %4160 = vst [vmem:[#allocation28_spill] sm:$0xff] %v2961_v30  ;;  %v2999_v35 = vsel %vm272_vm1, %v308_v31, %v309_v42  ;;  %v3027_v31 = vld [vmem:[%s2690_s11 + $0x58] sm:$0x3] }
  0x34   : > { %4162 = vst [vmem:[#allocation30_spill] sm:$0xff] %v2967_v41  ;;  %v3008_v41 = vld [vmem:[%s2690_s11 + $0xb8] sm:$0x3] }
  0x35   : > { %4163 = vst [vmem:[#allocation31_spill] sm:$0xff] %v2999_v35 }
  0x36   : > { %2160 = vmatmul.msk.f32.gmra.mxu1 %vm355_vm2, %v2843_v1  ;;  %4166 = vst [vmem:[#allocation34_spill] sm:$0xff] %v3011_v24 }
  0x37   : > { %2168 = vmatmul.msk.f32.gmra.mxu2 %vm355_vm2, %v2846_v2 }
  0x38   : > { %2176 = vmatmul.msk.f32.gmra.mxu3 %vm355_vm2, %v2849_v3  ;;  %v2964_v3 = vld [vmem:[%s2690_s11 + $0x168] sm:$0xff] }
  0x39   : > { %2152 = vmatmul.msk.f32.gmra.mxu0 %vm355_vm2, %v2872_v16  ;;  %4161 = vst [vmem:[#allocation29_spill] sm:$0xff] %v2964_v3 }
  0x3e   : > { %2161 = vmatmul.msk.f32.gmra.mxu1 %vm355_vm2, %v2895_v47 }
  0x3f   : > { %2169 = vmatmul.msk.f32.gmra.mxu2 %vm355_vm2, %v2901_v49 }
  0x40   : > { %2177 = vmatmul.msk.f32.gmra.mxu3 %vm355_vm2, %v2904_v50  ;;  %v2943_v50 = vsel %vm272_vm1, %v304_v25, %v306_v60  ;;  %v2972_v25 = vsel %vm272_vm1, %v284_v44, %v286_v15  ;;  %v2981_v60 = vld [vmem:[%s2690_s11 + $0x48] sm:$0xff]  ;;  %v2418_v15 = vld [vmem:[%s4057_s1 + $0x20] sm:$0xf]  ;;  %v328_v44 = vrot.slane %v2958_v14, 1 }
  0x41   : > { %2153 = vmatmul.msk.f32.gmra.mxu0 %vm355_vm2, %v2916_v62  ;;  %4158 = vst [vmem:[#allocation26_spill] sm:$0xff] %v2943_v50  ;;  %v288_v26 = vrot.slane %v2981_v60, 1 }
  0x42   : > { %2419 = vmatpush.msk.msra.mxu0 %vm420_vm0, %v2418_v15  ;;  %v3002_v13 = vsel %vm272_vm1, %v328_v44, %v329_v43  ;;  %v3014_v15 = vld [vmem:[%s2690_s11 + $0x178] sm:$0x3]  ;;  %v331_v44 = vrot.slane %v3011_v24, 1 }
  0x43   : > { %4164 = vst [vmem:[#allocation32_spill] sm:$0xff] %v3002_v13  ;;  %v3019_v12 = vsel %vm272_vm1, %v288_v26, %v289_v40  ;;  %v351_v30 = vrot.slane %v3014_v15, 1  ;;  %v291_v26 = vrot.slane %v3027_v31, 1 }
  0x45   : > { %v3046_v24 = vsel %vm272_vm1, %v289_v40, %v291_v26  ;;  %v721_v40 = vrot.slane %v2750_v28, 2  ;;  %v733_v26 = vrot.slane %v2981_v60, 2 }
  0x46   : > { %2162 = vmatmul.msk.f32.gmra.mxu1 %vm355_vm2, %v2943_v50 }
  0x47   : > { %2170 = vmatmul.msk.f32.gmra.mxu2 %vm355_vm2, %v2946_v58 }
  0x48   : > { %2178 = vmatmul.msk.f32.gmra.mxu3 %vm355_vm2, %v2949_v52  ;;  %v348_v52 = vrot.slane %v2964_v3, 1 }
  0x49   : > { %2154 = vmatmul.msk.f32.gmra.mxu0 %vm355_vm2, %v2972_v25 }
  0x4a   : > { %v3005_v3 = vsel %vm272_vm1, %v348_v52, %v349_v55  ;;  %v311_v52 = vrot.slane %v3008_v41, 1 }
  0x4b   : > { %4165 = vst [vmem:[#allocation33_spill] sm:$0xff] %v3005_v3 }
  0x4c   : > { %v3035_v51 = vsel %vm272_vm1, %v309_v42, %v311_v52  ;;  %v718_v42 = vrot.slane %v2720_v18, 2  ;;  %v724_v52 = vrot.slane %v2797_v46, 2 }
  0x4d   : > { %4167 = vst [vmem:[#allocation35_spill] sm:$0xff] %v3035_v51 }
  0x4e   : > { %2163 = vmatmul.msk.f32.gmra.mxu1 %vm355_vm2, %v2999_v35 }
  0x4f   : > { %2171 = vmatmul.msk.f32.gmra.mxu2 %vm355_vm2, %v3002_v13  ;;  %v3038_v13 = vsel %vm272_vm1, %v329_v43, %v331_v44  ;;  %v719_v43 = vrot.slane %v2729_v21, 2 }
  0x50   : > { %2179 = vmatmul.msk.f32.gmra.mxu3 %vm355_vm2, %v3005_v3  ;;  %v3041_v3 = vsel %vm272_vm1, %v349_v55, %v351_v30 }
  0x51   : > { %2155 = vmatmul.msk.f32.gmra.mxu0 %vm355_vm2, %v3019_v12  ;;  %4168 = vst [vmem:[#allocation36_spill] sm:$0xff] %v3041_v3  ;;  %v720_v55 = vsel %vm717_vm3, %v718_v42, %v719_v43  ;;  %v722_v30 = vsel %vm717_vm3, %v719_v43, %v721_v40  ;;  %v734_v42 = vrot.slane %v2984_v32, 2  ;;  %v736_v43 = vrot.slane %v3027_v31, 2 }
  0x52   : > { %v738_v40 = vrot.slane %v2693_v5, 2 }
  0x56   : > { %2164 = vmatmul.msk.f32.gmra.mxu1 %vm355_vm2, %v3035_v51 }
  0x57   : > { %2172 = vmatmul.msk.f32.gmra.mxu2 %vm355_vm2, %v3038_v13 }
  0x58   : > { %2180 = vmatmul.msk.f32.gmra.mxu3 %vm355_vm2, %v3041_v3 }
  0x59   : > { %2156 = vmatmul.msk.f32.gmra.mxu0 %vm355_vm2, %v3046_v24 }
  0x5e   : > { %2182 = vmatmul.msk.f32.vlgmr.msrb.gmra.mxu1 %vm355_vm2, %v2720_v18  ;;  %v723_v18 = vrot.slane %v2794_v45, 2 }
  0x5f   : > { %2216 = vmatmul.msk.f32.vlgmr.msrb.gmra.mxu2 %vm355_vm2, %v720_v55  ;;  %v3138_v55 = vsel %vm717_vm3, %v734_v42, %v736_v43 }
  0x60   : > { %2250 = vmatmul.msk.f32.vlgmr.msrb.gmra.mxu3 %vm355_vm2, %v2794_v45  ;;  %v3076_v28 = vsel %vm717_vm3, %v723_v18, %v724_v52 }
  0x61   : > { %2284 = vmatmul.msk.f32.vlgmr.msrb.gmra.mxu0 %vm355_vm2, %v2827_v59 }
  0x66   : > { %2183 = vmatmul.msk.f32.gmra.mxu1 %vm355_vm2, %v2729_v21  ;;  %v726_v21 = vrot.slane %v2835_v61, 2 }
  0x67   : > { %2217 = vmatmul.msk.f32.gmra.mxu2 %vm355_vm2, %v722_v30  ;;  %v739_v30 = vrot.slane %v2696_v6, 2 }
  0x68   : > { %2251 = vmatmul.msk.f32.gmra.mxu3 %vm355_vm2, %v2797_v46  ;;  %v3088_v59 = vsel %vm717_vm3, %v724_v52, %v726_v21  ;;  %v741_v21 = vrot.slane %v2717_v17, 2  ;;  %v743_v17 = vrot.slane %v2767_v36, 2 }
  0x69   : > { %2285 = vmatmul.msk.f32.gmra.mxu0 %vm355_vm2, %v2872_v16  ;;  %v729_v16 = vrot.slane %v2884_v29, 2  ;;  %v3153_v18 = vsel %vm717_vm3, %v738_v40, %v739_v30 }
  0x6a   : > { %4169 = vst [vmem:[#allocation37_spill] sm:$0xff] %v3153_v18 }
  0x6e   : > { %2184 = vmatmul.msk.f32.gmra.mxu1 %vm355_vm2, %v2794_v45  ;;  %v728_v45 = vrot.slane %v2881_v27, 2 }
  0x6f   : > { %2218 = vmatmul.msk.f32.gmra.mxu2 %vm355_vm2, %v3076_v28 }
  0x70   : > { %2252 = vmatmul.msk.f32.gmra.mxu3 %vm355_vm2, %v2881_v27  ;;  %v3101_v61 = vsel %vm717_vm3, %v728_v45, %v729_v16 }
  0x71   : > { %2286 = vmatmul.msk.f32.gmra.mxu0 %vm355_vm2, %v2916_v62 }
  0x76   : > { %2185 = vmatmul.msk.f32.gmra.mxu1 %vm355_vm2, %v2797_v46  ;;  %v731_v46 = vrot.slane %v2919_v63, 2  ;;  %v3126_v63 = vsel %vm717_vm3, %v733_v26, %v734_v42  ;;  %v744_v42 = vrot.slane %v2770_v37, 2 }
  0x77   : > { %2219 = vmatmul.msk.f32.gmra.mxu2 %vm355_vm2, %v3088_v59 }
  0x78   : > { %2253 = vmatmul.msk.f32.gmra.mxu3 %vm355_vm2, %v2884_v29  ;;  %v3113_v44 = vsel %vm717_vm3, %v729_v16, %v731_v46 }
  0x79   : > { %2287 = vmatmul.msk.f32.gmra.mxu0 %vm355_vm2, %v2972_v25 }
  0x7e   : > { %2186 = vmatmul.msk.f32.gmra.mxu1 %vm355_vm2, %v2881_v27 }
  0x7f   : > { %2220 = vmatmul.msk.f32.gmra.mxu2 %vm355_vm2, %v3101_v61 }
  0x80   : > { %2254 = vmatmul.msk.f32.gmra.mxu3 %vm355_vm2, %v2981_v60 }
  0x81   : > { %2288 = vmatmul.msk.f32.gmra.mxu0 %vm355_vm2, %v3019_v12 }
  0x86   : > { %2187 = vmatmul.msk.f32.gmra.mxu1 %vm355_vm2, %v2884_v29 }
  0x87   : > { %2221 = vmatmul.msk.f32.gmra.mxu2 %vm355_vm2, %v3113_v44 }
  0x88   : > { %2255 = vmatmul.msk.f32.gmra.mxu3 %vm355_vm2, %v2984_v32 }
  0x89   : > { %2289 = vmatmul.msk.f32.gmra.mxu0 %vm355_vm2, %v3046_v24 }
  0x8e   : > { %2188 = vmatmul.msk.f32.gmra.mxu1 %vm355_vm2, %v2981_v60 }
  0x8f   : > { %2222 = vmatmul.msk.f32.gmra.mxu2 %vm355_vm2, %v3126_v63 }
  0x90   : > { %2256 = vmatmul.msk.f32.gmra.mxu3 %vm355_vm2, %v2693_v5 }
  0x91   : > { %2290 = vmatmul.msk.f32.gmra.mxu0 %vm355_vm2, %v2723_v19 }
  0x96   : > { %2189 = vmatmul.msk.f32.gmra.mxu1 %vm355_vm2, %v2984_v32 }
  0x97   : > { %2223 = vmatmul.msk.f32.gmra.mxu2 %vm355_vm2, %v3138_v55 }
  0x98   : > { %2257 = vmatmul.msk.f32.gmra.mxu3 %vm355_vm2, %v2696_v6 }
  0x99   : > { %2291 = vmatmul.msk.f32.gmra.mxu0 %vm355_vm2, %v2758_v33 }
  0x9b   : > { %v3150_v31 = vpop.f32.mrf.mxu1 }
  0x9e   : > { %2190 = vmatmul.msk.f32.gmra.mxu1 %vm355_vm2, %v2693_v5  ;;  %v3157_v52 = vpop.f32.mrf.mxu0  ;;  %v3173_v5 = vsel %vm717_vm3, %v739_v30, %v741_v21  ;;  %v3194_v30 = vsel %vm717_vm3, %v743_v17, %v744_v42 }
  0x9f   : > { %2224 = vmatmul.msk.f32.gmra.mxu2 %vm355_vm2, %v3153_v18  ;;  %4171 = vst [vmem:[#allocation39_spill] sm:$0xff] %v3173_v5 }
  0xa0   : > { %2258 = vmatmul.msk.f32.gmra.mxu3 %vm355_vm2, %v2767_v36  ;;  %4173 = vst [vmem:[#allocation41_spill] sm:$0xff] %v3194_v30 }
  0xa1   : > { %2292 = vmatmul.msk.f32.gmra.mxu0 %vm355_vm2, %v2807_v53 }
  0xa2   : > { %v3166_v45 = vpop.f32.mrf.mxu2 }
  0xa3   : > { %v3168_v16 = vpop.f32.mrf.mxu3  ;;  %v3170_v46 = vpop.f32.mrf.mxu1 }
  0xa4   : > { %4170 = vst [vmem:[#allocation38_spill] sm:$0xff] %v3168_v16  ;;  %v746_v16 = vrot.slane %v2816_v56, 2  ;;  %v748_v56 = vrot.slane %v2852_v4, 2 }
  0xa6   : > { %2191 = vmatmul.msk.f32.gmra.mxu1 %vm355_vm2, %v2696_v6  ;;  %v3177_v26 = vpop.f32.mrf.mxu0 }
  0xa7   : > { %2225 = vmatmul.msk.f32.gmra.mxu2 %vm355_vm2, %v3173_v5 }
  0xa8   : > { %2259 = vmatmul.msk.f32.gmra.mxu3 %vm355_vm2, %v2770_v37 }
  0xa9   : > { %2293 = vmatmul.msk.f32.gmra.mxu0 %vm355_vm2, %v2843_v1 }
  0xaa   : > { %v3187_v43 = vpop.f32.mrf.mxu2 }
  0xab   : > { %v3189_v40 = vpop.f32.mrf.mxu3  ;;  %v3191_v6 = vpop.f32.mrf.mxu1 }
  0xac   : > { %4172 = vst [vmem:[#allocation40_spill] sm:$0xff] %v3189_v40 }
  0xae   : > { %2192 = vmatmul.msk.f32.gmra.mxu1 %vm355_vm2, %v2767_v36  ;;  %v3198_v21 = vpop.f32.mrf.mxu0  ;;  %v3214_v36 = vsel %vm717_vm3, %v744_v42, %v746_v16 }
  0xaf   : > { %2226 = vmatmul.msk.f32.gmra.mxu2 %vm355_vm2, %v3194_v30  ;;  %4175 = vst [vmem:[#allocation43_spill] sm:$0xff] %v3214_v36 }
  0xb0   : > { %2260 = vmatmul.msk.f32.gmra.mxu3 %vm355_vm2, %v2852_v4 }
  0xb1   : > { %2294 = vmatmul.msk.f32.gmra.mxu0 %vm355_vm2, %v2895_v47 }
  0xb2   : > { %v3207_v40 = vpop.f32.mrf.mxu2 }
  0xb3   : > { %v3209_v17 = vpop.f32.mrf.mxu3  ;;  %v3211_v1 = vpop.f32.mrf.mxu1 }
  0xb4   : > { %4174 = vst [vmem:[#allocation42_spill] sm:$0xff] %v3209_v17  ;;  %v749_v17 = vrot.slane %v2855_v8, 2 }
  0xb6   : > { %2193 = vmatmul.msk.f32.gmra.mxu1 %vm355_vm2, %v2770_v37  ;;  %v3218_v30 = vpop.f32.mrf.mxu0  ;;  %v3235_v47 = vsel %vm717_vm3, %v748_v56, %v749_v17 }
  0xb7   : > { %2227 = vmatmul.msk.f32.gmra.mxu2 %vm355_vm2, %v3214_v36  ;;  %4177 = vst [vmem:[#allocation45_spill] sm:$0xff] %v3235_v47 }
  0xb8   : > { %2261 = vmatmul.msk.f32.gmra.mxu3 %vm355_vm2, %v2855_v8 }
  0xb9   : > { %2295 = vmatmul.msk.f32.gmra.mxu0 %vm355_vm2, %v2943_v50  ;;  %v751_v50 = vrot.slane %v2898_v48, 2  ;;  %v753_v48 = vrot.slane %v2952_v0, 2 }
  0xba   : > { %v3228_v16 = vpop.f32.mrf.mxu2 }
  0xbb   : > { %v3230_v42 = vpop.f32.mrf.mxu3  ;;  %v3232_v37 = vpop.f32.mrf.mxu1 }
  0xbc   : > { %4176 = vst [vmem:[#allocation44_spill] sm:$0xff] %v3230_v42 }
  0xbe   : > { %2194 = vmatmul.msk.f32.gmra.mxu1 %vm355_vm2, %v2852_v4  ;;  %v3239_v36 = vpop.f32.mrf.mxu0  ;;  %v3255_v4 = vsel %vm717_vm3, %v749_v17, %v751_v50 }
  0xbf   : > { %2228 = vmatmul.msk.f32.gmra.mxu2 %vm355_vm2, %v3235_v47  ;;  %4179 = vst [vmem:[#allocation47_spill] sm:$0xff] %v3255_v4 }
  0xc0   : > { %2262 = vmatmul.msk.f32.gmra.mxu3 %vm355_vm2, %v2952_v0 }
  0xc1   : > { %2296 = vmatmul.msk.f32.gmra.mxu0 %vm355_vm2, %v2999_v35 }
  0xc2   : > { %v3248_v42 = vpop.f32.mrf.mxu2 }
  0xc3   : > { %v3250_v56 = vpop.f32.mrf.mxu3  ;;  %v3252_v53 = vpop.f32.mrf.mxu1 }
  0xc4   : > { %4178 = vst [vmem:[#allocation46_spill] sm:$0xff] %v3250_v56  ;;  %v754_v56 = vrot.slane %v2955_v22, 2 }
  0xc6   : > { %2195 = vmatmul.msk.f32.gmra.mxu1 %vm355_vm2, %v2855_v8  ;;  %v3259_v47 = vpop.f32.mrf.mxu0  ;;  %v3276_v35 = vsel %vm717_vm3, %v753_v48, %v754_v56 }
  0xc7   : > { %2229 = vmatmul.msk.f32.gmra.mxu2 %vm355_vm2, %v3255_v4  ;;  %4182 = vst [vmem:[#allocation50_spill] sm:$0xff] %v3276_v35 }
  0xc8   : > { %2263 = vmatmul.msk.f32.gmra.mxu3 %vm355_vm2, %v2955_v22 }
  0xc9   : > { %2297 = vmatmul.msk.f32.gmra.mxu0 %vm355_vm2, %v3035_v51  ;;  %v756_v51 = vrot.slane %v3008_v41, 2  ;;  %v758_v41 = vrot.slane %v2699_v7, 2 }
  0xca   : > { %v3269_v50 = vpop.f32.mrf.mxu2 }
  0xcb   : > { %4180 = vst [vmem:[#allocation48_spill] sm:$0xff] %v3269_v50  ;;  %v3271_v17 = vpop.f32.mrf.mxu3  ;;  %v3273_v8 = vpop.f32.mrf.mxu1 }
  0xcc   : > { %4181 = vst [vmem:[#allocation49_spill] sm:$0xff] %v3271_v17 }
  0xce   : > { %2196 = vmatmul.msk.f32.gmra.mxu1 %vm355_vm2, %v2952_v0  ;;  %v3280_v4 = vpop.f32.mrf.mxu0  ;;  %v3296_v0 = vsel %vm717_vm3, %v754_v56, %v756_v51 }
  0xcf   : > { %2230 = vmatmul.msk.f32.gmra.mxu2 %vm355_vm2, %v3276_v35  ;;  %4185 = vst [vmem:[#allocation53_spill] sm:$0xff] %v3296_v0 }
  0xd0   : > { %2264 = vmatmul.msk.f32.gmra.mxu3 %vm355_vm2, %v2699_v7 }
  0xd1   : > { %2298 = vmatmul.msk.f32.gmra.mxu0 %vm355_vm2, %v2735_v23 }
  0xd2   : > { %v3289_v17 = vpop.f32.mrf.mxu2 }
  0xd3   : > { %4183 = vst [vmem:[#allocation51_spill] sm:$0xff] %v3289_v17  ;;  %v3291_v48 = vpop.f32.mrf.mxu3  ;;  %v3293_v5 = vpop.f32.mrf.mxu1 }
  0xd4   : > { %4184 = vst [vmem:[#allocation52_spill] sm:$0xff] %v3291_v48  ;;  %v759_v48 = vrot.slane %v2704_v10, 2 }
  0xd6   : > { %2197 = vmatmul.msk.f32.gmra.mxu1 %vm355_vm2, %v2955_v22  ;;  %v3300_v35 = vpop.f32.mrf.mxu0  ;;  %v3315_v23 = vsel %vm717_vm3, %v758_v41, %v759_v48 }
  0xd7   : > { %2231 = vmatmul.msk.f32.gmra.mxu2 %vm355_vm2, %v3296_v0  ;;  %4188 = vst [vmem:[#allocation56_spill] sm:$0xff] %v3315_v23 }
  0xd8   : > { %2265 = vmatmul.msk.f32.gmra.mxu3 %vm355_vm2, %v2704_v10 }
  0xd9   : > { %2299 = vmatmul.msk.f32.gmra.mxu0 %vm355_vm2, %v2761_v34  ;;  %v761_v34 = vrot.slane %v2726_v20, 2  ;;  %v763_v20 = vrot.slane %v2773_v38, 2 }
  0xda   : > { %v3310_v51 = vpop.f32.mrf.mxu2 }
  0xdb   : > { %4186 = vst [vmem:[#allocation54_spill] sm:$0xff] %v3310_v51  ;;  %v3312_v56 = vpop.f32.mrf.mxu3  ;;  %v621_v22 = vpop.f32.mrf.mxu1 }
  0xdc   : > { %4187 = vst [vmem:[#allocation55_spill] sm:$0xff] %v3312_v56  ;;  %v622_v51 = vadd.f32 %v621_v22, %v3157_v52  ;;  %v764_v52 = vrot.slane %v2776_v39, 2 }
  0xde   : > { %2198 = vmatmul.msk.f32.gmra.mxu1 %vm355_vm2, %v2699_v7  ;;  %v1200_v0 = vpop.f32.mrf.mxu0  ;;  %v3328_v7 = vsel %vm717_vm3, %v759_v48, %v761_v34 }
  0xdf   : > { %2232 = vmatmul.msk.f32.gmra.mxu2 %vm355_vm2, %v3315_v23 }
  0xe0   : > { %2266 = vmatmul.msk.f32.gmra.mxu3 %vm355_vm2, %v2773_v38 }
  0xe1   : > { %2300 = vmatmul.msk.f32.gmra.mxu0 %vm355_vm2, %v2810_v54 }
  0xe2   : > { %v884_v56 = vpop.f32.mrf.mxu2 }
  0xe3   : > { %v1040_v41 = vpop.f32.mrf.mxu3  ;;  %v980_v17 = vadd.f32 %v884_v56, %v622_v51  ;;  %v624_v50 = vpop.f32.mrf.mxu1 }
  0xe4   : > { %v625_v34 = vadd.f32 %v624_v50, %v3177_v26  ;;  %v766_v26 = vrot.slane %v2819_v57, 2  ;;  %v768_v57 = vrot.slane %v2858_v9, 2 }
  0xe5   : > { %v1136_v33 = vadd.f32 %v1040_v41, %v980_v17 }
  0xe6   : > { %2199 = vmatmul.msk.f32.gmra.mxu1 %vm355_vm2, %v2704_v10  ;;  %v1203_v23 = vpop.f32.mrf.mxu0 }
  0xe7   : > { %v3332_v18 = vadd.f32 %v1200_v0, %v1136_v33  ;;  %2233 = vmatmul.msk.f32.gmra.mxu2 %vm355_vm2, %v3328_v7  ;;  %v3344_v0 = vsel %vm717_vm3, %v763_v20, %v764_v52 }
  0xe8   : > { %2267 = vmatmul.msk.f32.gmra.mxu3 %vm355_vm2, %v2776_v39 }
  0xe9   : > { %2301 = vmatmul.msk.f32.gmra.mxu0 %vm355_vm2, %v2846_v2 }
  0xea   : > { %v887_v17 = vpop.f32.mrf.mxu2 }
  0xeb   : > { %v1043_v10 = vpop.f32.mrf.mxu3  ;;  %v981_v48 = vadd.f32 %v887_v17, %v625_v34  ;;  %v627_v33 = vpop.f32.mrf.mxu1 }
  0xec   : > { %v628_v50 = vadd.f32 %v627_v33, %v3198_v21  ;;  %v769_v21 = vrot.slane %v2861_v11, 2 }
  0xed   : > { %v1137_v51 = vadd.f32 %v1043_v10, %v981_v48 }
  0xee   : > { %2200 = vmatmul.msk.f32.gmra.mxu1 %vm355_vm2, %v2773_v38  ;;  %v1206_v56 = vpop.f32.mrf.mxu0 }
  0xef   : > { %v3348_v22 = vadd.f32 %v1203_v23, %v1137_v51  ;;  %2234 = vmatmul.msk.f32.gmra.mxu2 %vm355_vm2, %v3344_v0  ;;  %v3359_v23 = vsel %vm717_vm3, %v764_v52, %v766_v26  ;;  %v3375_v26 = vsel %vm717_vm3, %v768_v57, %v769_v21 }
  0xf0   : > { %2268 = vmatmul.msk.f32.gmra.mxu3 %vm355_vm2, %v2858_v9 }
  0xf1   : > { %2302 = vmatmul.msk.f32.gmra.mxu0 %vm355_vm2, %v2901_v49 }
  0xf2   : > { %v890_v41 = vpop.f32.mrf.mxu2 }
  0xf3   : > { %v1046_v20 = vpop.f32.mrf.mxu3  ;;  %v982_v34 = vadd.f32 %v890_v41, %v628_v50  ;;  %v630_v38 = vpop.f32.mrf.mxu1 }
  0xf4   : > { %v631_v52 = vadd.f32 %v630_v38, %v3218_v30  ;;  %v4190_v30 = vld [vmem:[#allocation24_spill] sm:$0xff] }
  0xf5   : > { %v1138_v17 = vadd.f32 %v1046_v20, %v982_v34  ;;  %v771_v34 = vrot.slane %v4190_v30, 2 }
  0xf6   : > { %2201 = vmatmul.msk.f32.gmra.mxu1 %vm355_vm2, %v2776_v39  ;;  %v1209_v10 = vpop.f32.mrf.mxu0 }
  0xf7   : > { %v3363_v48 = vadd.f32 %v1206_v56, %v1138_v17  ;;  %2235 = vmatmul.msk.f32.gmra.mxu2 %vm355_vm2, %v3359_v23  ;;  %v4191_v17 = vld [vmem:[#allocation32_spill] sm:$0xff] }
  0xf8   : > { %2269 = vmatmul.msk.f32.gmra.mxu3 %vm355_vm2, %v2861_v11 }
  0xf9   : > { %2303 = vmatmul.msk.f32.gmra.mxu0 %vm355_vm2, %v2946_v58 }
  0xfa   : > { %v893_v33 = vpop.f32.mrf.mxu2 }
  0xfb   : > { %v1049_v39 = vpop.f32.mrf.mxu3  ;;  %v983_v51 = vadd.f32 %v893_v33, %v631_v52  ;;  %v633_v56 = vpop.f32.mrf.mxu1 }
  0xfc   : > { %v634_v38 = vadd.f32 %v633_v56, %v3239_v36  ;;  %v4193_v36 = vld [vmem:[#allocation28_spill] sm:$0xff]  ;;  %v773_v56 = vrot.slane %v2958_v14, 2 }
  0xfd   : > { %v1139_v50 = vadd.f32 %v1049_v39, %v983_v51  ;;  %v774_v30 = vrot.slane %v4193_v36, 2 }
  0xfe   : > { %2202 = vmatmul.msk.f32.gmra.mxu1 %vm355_vm2, %v2858_v9  ;;  %v1212_v41 = vpop.f32.mrf.mxu0 }
  0xff   : > { %v3379_v20 = vadd.f32 %v1209_v10, %v1139_v50  ;;  %2236 = vmatmul.msk.f32.gmra.mxu2 %vm355_vm2, %v3375_v26  ;;  %v3390_v10 = vsel %vm717_vm3, %v769_v21, %v771_v34 }
 0x100   : > { %2270 = vmatmul.msk.f32.gmra.mxu3 %vm355_vm2, %v2958_v14 }
 0x101   : > { %4189 = vst [vmem:[#allocation57_spill] sm:$0xff] %v3379_v20  ;;  %2304 = vmatmul.msk.f32.gmra.mxu0 %vm355_vm2, %v4191_v17 }
 0x102   : > { %v896_v57 = vpop.f32.mrf.mxu2 }
 0x103   : > { %v1052_v52 = vpop.f32.mrf.mxu3  ;;  %v984_v33 = vadd.f32 %v896_v57, %v634_v38  ;;  %v636_v9 = vpop.f32.mrf.mxu1  ;;  %v3406_v57 = vsel %vm717_vm3, %v773_v56, %v774_v30 }
 0x104   : > { %v637_v21 = vadd.f32 %v636_v9, %v3259_v47  ;;  %v4195_v47 = vld [vmem:[#allocation5_spill] sm:$0xff]  ;;  %v4196_v9 = vld [vmem:[#allocation34_spill] sm:$0xff] }
 0x105   : > { %v1140_v39 = vadd.f32 %v1052_v52, %v984_v33 }
 0x106   : > { %2203 = vmatmul.msk.f32.gmra.mxu1 %vm355_vm2, %v2861_v11  ;;  %v1215_v51 = vpop.f32.mrf.mxu0 }
 0x107   : > { %v3394_v50 = vadd.f32 %v1212_v41, %v1140_v39  ;;  %2237 = vmatmul.msk.f32.gmra.mxu2 %vm355_vm2, %v3390_v10 }
 0x108   : > { %2271 = vmatmul.msk.f32.gmra.mxu3 %vm355_vm2, %v4193_v36 }
 0x109   : > { %4192 = vst [vmem:[#allocation24_spill] sm:$0xff] %v3394_v50  ;;  %2305 = vmatmul.msk.f32.gmra.mxu0 %vm355_vm2, %v3038_v13  ;;  %v776_v50 = vrot.slane %v4196_v9, 2 }
 0x10a   : > { %v899_v34 = vpop.f32.mrf.mxu2 }
 0x10b   : > { %v1055_v11 = vpop.f32.mrf.mxu3  ;;  %v985_v38 = vadd.f32 %v899_v34, %v637_v21  ;;  %v639_v41 = vpop.f32.mrf.mxu1  ;;  %v4197_v34 = vld [vmem:[#allocation8_spill] sm:$0xff] }
 0x10c   : > { %v640_v21 = vadd.f32 %v639_v41, %v3280_v4  ;;  %v4199_v4 = vld [vmem:[#allocation6_spill] sm:$0xff]  ;;  %v778_v41 = vrot.slane %v4195_v47, 2 }
 0x10d   : > { %v1141_v52 = vadd.f32 %v1055_v11, %v985_v38  ;;  %v779_v9 = vrot.slane %v4199_v4, 2 }
 0x10e   : > { %2204 = vmatmul.msk.f32.gmra.mxu1 %vm355_vm2, %v2958_v14  ;;  %v1218_v33 = vpop.f32.mrf.mxu0 }
 0x10f   : > { %v3410_v39 = vadd.f32 %v1215_v51, %v1141_v52  ;;  %2238 = vmatmul.msk.f32.gmra.mxu2 %vm355_vm2, %v3406_v57  ;;  %v3421_v51 = vsel %vm717_vm3, %v774_v30, %v776_v50  ;;  %v4200_v30 = vld [vmem:[#allocation12_spill] sm:$0xff] }
 0x110   : > { %2272 = vmatmul.msk.f32.gmra.mxu3 %vm355_vm2, %v4195_v47 }
 0x111   : > { %4194 = vst [vmem:[#allocation32_spill] sm:$0xff] %v3410_v39  ;;  %2306 = vmatmul.msk.f32.gmra.mxu0 %vm355_vm2, %v4197_v34 }
 0x112   : > { %v902_v56 = vpop.f32.mrf.mxu2 }
 0x113   : > { %v1058_v11 = vpop.f32.mrf.mxu3  ;;  %v986_v38 = vadd.f32 %v902_v56, %v640_v21  ;;  %v642_v14 = vpop.f32.mrf.mxu1 }
 0x114   : > { %v643_v50 = vadd.f32 %v642_v14, %v3300_v35  ;;  %v4203_v35 = vld [vmem:[#allocation13_spill] sm:$0xff] }
 0x115   : > { %v1142_v52 = vadd.f32 %v1058_v11, %v986_v38  ;;  %v3437_v11 = vsel %vm717_vm3, %v778_v41, %v779_v9  ;;  %v4204_v14 = vld [vmem:[#allocation9_spill] sm:$0xff] }
 0x116   : > { %2205 = vmatmul.msk.f32.gmra.mxu1 %vm355_vm2, %v4193_v36  ;;  %v1221_v39 = vpop.f32.mrf.mxu0  ;;  %4201 = vst [vmem:[#allocation5_spill] sm:$0xff] %v3437_v11 }
 0x117   : > { %v3425_v20 = vadd.f32 %v1218_v33, %v1142_v52  ;;  %2239 = vmatmul.msk.f32.gmra.mxu2 %vm355_vm2, %v3421_v51 }
 0x118   : > { %2273 = vmatmul.msk.f32.gmra.mxu3 %vm355_vm2, %v4199_v4 }
 0x119   : > { %4198 = vst [vmem:[#allocation28_spill] sm:$0xff] %v3425_v20  ;;  %2307 = vmatmul.msk.f32.gmra.mxu0 %vm355_vm2, %v4200_v30  ;;  %v781_v30 = vrot.slane %v4204_v14, 2 }
 0x11a   : > { %v905_v21 = vpop.f32.mrf.mxu2 }
 0x11b   : > { %v1061_v36 = vpop.f32.mrf.mxu3  ;;  %v987_v56 = vadd.f32 %v905_v21, %v643_v50  ;;  %v645_v33 = vpop.f32.mrf.mxu1  ;;  %v4205_v21 = vld [vmem:[#allocation16_spill] sm:$0xff] }
 0x11c   : > { %v646_v50 = vadd.f32 %v645_v33, %v3150_v31  ;;  %v4207_v31 = vld [vmem:[#allocation14_spill] sm:$0xff]  ;;  %v783_v33 = vrot.slane %v4203_v35, 2 }
 0x11d   : > { %v1143_v38 = vadd.f32 %v1061_v36, %v987_v56  ;;  %v784_v14 = vrot.slane %v4207_v31, 2 }
 0x11e   : > { %2206 = vmatmul.msk.f32.gmra.mxu1 %vm355_vm2, %v4195_v47  ;;  %v1224_v52 = vpop.f32.mrf.mxu0 }
 0x11f   : > { %v3441_v20 = vadd.f32 %v1221_v39, %v1143_v38  ;;  %2240 = vmatmul.msk.f32.gmra.mxu2 %vm355_vm2, %v3437_v11  ;;  %v3452_v39 = vsel %vm717_vm3, %v779_v9, %v781_v30  ;;  %v4208_v30 = vld [vmem:[#allocation19_spill] sm:$0xff] }
 0x120   : > { %2274 = vmatmul.msk.f32.gmra.mxu3 %vm355_vm2, %v4203_v35 }
 0x121   : > { %4202 = vst [vmem:[#allocation34_spill] sm:$0xff] %v3441_v20  ;;  %2308 = vmatmul.msk.f32.gmra.mxu0 %vm355_vm2, %v4205_v21 }
 0x122   : > { %v908_v41 = vpop.f32.mrf.mxu2 }
 0x123   : > { %v1064_v36 = vpop.f32.mrf.mxu3  ;;  %v988_v56 = vadd.f32 %v908_v41, %v646_v50  ;;  %v648_v47 = vpop.f32.mrf.mxu1 }
 0x124   : > { %v649_v9 = vadd.f32 %v648_v47, %v3170_v46  ;;  %v4211_v46 = vld [vmem:[#allocation20_spill] sm:$0xff]  ;;  %v4212_v47 = vld [vmem:[#allocation17_spill] sm:$0xff] }
 0x125   : > { %v1144_v38 = vadd.f32 %v1064_v36, %v988_v56  ;;  %v3468_v36 = vsel %vm717_vm3, %v783_v33, %v784_v14 }
 0x126   : > { %2207 = vmatmul.msk.f32.gmra.mxu1 %vm355_vm2, %v4199_v4  ;;  %v1227_v20 = vpop.f32.mrf.mxu0  ;;  %4209 = vst [vmem:[#allocation6_spill] sm:$0xff] %v3468_v36 }
 0x127   : > { %v3456_v11 = vadd.f32 %v1224_v52, %v1144_v38  ;;  %2241 = vmatmul.msk.f32.gmra.mxu2 %vm355_vm2, %v3452_v39 }
 0x128   : > { %2275 = vmatmul.msk.f32.gmra.mxu3 %vm355_vm2, %v4207_v31 }
 0x129   : > { %4206 = vst [vmem:[#allocation8_spill] sm:$0xff] %v3456_v11  ;;  %2309 = vmatmul.msk.f32.gmra.mxu0 %vm355_vm2, %v4208_v30  ;;  %v786_v30 = vrot.slane %v4212_v47, 2 }
 0x12a   : > { %v911_v50 = vpop.f32.mrf.mxu2 }
 0x12b   : > { %v1067_v4 = vpop.f32.mrf.mxu3  ;;  %v989_v41 = vadd.f32 %v911_v50, %v649_v9  ;;  %v651_v52 = vpop.f32.mrf.mxu1  ;;  %v4213_v50 = vld [vmem:[#allocation23_spill] sm:$0xff] }
 0x12c   : > { %v652_v9 = vadd.f32 %v651_v52, %v3191_v6  ;;  %v4215_v6 = vld [vmem:[#allocation21_spill] sm:$0xff]  ;;  %v788_v52 = vrot.slane %v4211_v46, 2 }
 0x12d   : > { %v1145_v56 = vadd.f32 %v1067_v4, %v989_v41  ;;  %v789_v47 = vrot.slane %v4215_v6, 2 }
 0x12e   : > { %2208 = vmatmul.msk.f32.gmra.mxu1 %vm355_vm2, %v4203_v35  ;;  %v1230_v38 = vpop.f32.mrf.mxu0 }
 0x12f   : > { %v3472_v11 = vadd.f32 %v1227_v20, %v1145_v56  ;;  %2242 = vmatmul.msk.f32.gmra.mxu2 %vm355_vm2, %v3468_v36  ;;  %v3483_v20 = vsel %vm717_vm3, %v784_v14, %v786_v30  ;;  %v4216_v30 = vld [vmem:[#allocation27_spill] sm:$0xff] }
 0x130   : > { %2276 = vmatmul.msk.f32.gmra.mxu3 %vm355_vm2, %v4211_v46 }
 0x131   : > { %4210 = vst [vmem:[#allocation13_spill] sm:$0xff] %v3472_v11  ;;  %2310 = vmatmul.msk.f32.gmra.mxu0 %vm355_vm2, %v4213_v50 }
 0x132   : > { %v914_v33 = vpop.f32.mrf.mxu2 }
 0x133   : > { %v1070_v4 = vpop.f32.mrf.mxu3  ;;  %v990_v41 = vadd.f32 %v914_v33, %v652_v9  ;;  %v654_v35 = vpop.f32.mrf.mxu1 }
 0x134   : > { %v655_v14 = vadd.f32 %v654_v35, %v3211_v1  ;;  %v4219_v1 = vld [vmem:[#allocation29_spill] sm:$0xff] }
 0x135   : > { %v1146_v56 = vadd.f32 %v1070_v4, %v990_v41  ;;  %v3499_v4 = vsel %vm717_vm3, %v788_v52, %v789_v47  ;;  %v4220_v35 = vld [vmem:[#allocation25_spill] sm:$0xff] }
 0x136   : > { %2209 = vmatmul.msk.f32.gmra.mxu1 %vm355_vm2, %v4207_v31  ;;  %v1233_v11 = vpop.f32.mrf.mxu0  ;;  %4217 = vst [vmem:[#allocation16_spill] sm:$0xff] %v3499_v4  ;;  %v4221_v52 = vld [vmem:[#allocation33_spill] sm:$0xff] }
 0x137   : > { %v3487_v36 = vadd.f32 %v1230_v38, %v1146_v56  ;;  %2243 = vmatmul.msk.f32.gmra.mxu2 %vm355_vm2, %v3483_v20 }
 0x138   : > { %2277 = vmatmul.msk.f32.gmra.mxu3 %vm355_vm2, %v4215_v6 }
 0x139   : > { %4214 = vst [vmem:[#allocation9_spill] sm:$0xff] %v3487_v36  ;;  %2311 = vmatmul.msk.f32.gmra.mxu0 %vm355_vm2, %v4216_v30 }
 0x13a   : > { %v917_v9 = vpop.f32.mrf.mxu2 }
 0x13b   : > { %v1073_v31 = vpop.f32.mrf.mxu3  ;;  %v991_v33 = vadd.f32 %v917_v9, %v655_v14  ;;  %v657_v38 = vpop.f32.mrf.mxu1  ;;  %v791_v14 = vrot.slane %v4220_v35, 2  ;;  %v793_v35 = vrot.slane %v4219_v1, 2 }
 0x13c   : > { %v658_v9 = vadd.f32 %v657_v38, %v3232_v37  ;;  %v4223_v37 = vld [vmem:[#allocation30_spill] sm:$0xff] }
 0x13d   : > { %v1147_v41 = vadd.f32 %v1073_v31, %v991_v33  ;;  %v3525_v38 = vld [vmem:[%s2690_s11 + $0x188] sm:$0xff] }
 0x13e   : > { %2210 = vmatmul.msk.f32.gmra.mxu1 %vm355_vm2, %v4211_v46  ;;  %v1236_v56 = vpop.f32.mrf.mxu0 }
 0x13f   : > { %v3503_v36 = vadd.f32 %v1233_v11, %v1147_v41  ;;  %2244 = vmatmul.msk.f32.gmra.mxu2 %vm355_vm2, %v3499_v4  ;;  %v3514_v41 = vsel %vm717_vm3, %v789_v47, %v791_v14  ;;  %v794_v47 = vrot.slane %v4223_v37, 2 }
 0x140   : > { %2278 = vmatmul.msk.f32.gmra.mxu3 %vm355_vm2, %v4219_v1 }
 0x141   : > { %4218 = vst [vmem:[#allocation14_spill] sm:$0xff] %v3503_v36  ;;  %2312 = vmatmul.msk.f32.gmra.mxu0 %vm355_vm2, %v4221_v52 }
 0x142   : > { %v920_v31 = vpop.f32.mrf.mxu2 }
 0x143   : > { %v1076_v46 = vpop.f32.mrf.mxu3  ;;  %v992_v33 = vadd.f32 %v920_v31, %v658_v9  ;;  %v660_v11 = vpop.f32.mrf.mxu1  ;;  %v3531_v9 = vld [vmem:[%s2690_s11 + $0x180] sm:$0xff]  ;;  %v1170_v31 = vrot.slane %v3525_v38, 1 }
 0x144   : > { %v661_v14 = vadd.f32 %v660_v11, %v3252_v53  ;;  %4224 = vst [vmem:[#allocation17_spill] sm:$0xff] %v3531_v9 }
 0x145   : > { %v1148_v36 = vadd.f32 %v1076_v46, %v992_v33 }
 0x146   : > { %2211 = vmatmul.msk.f32.gmra.mxu1 %vm355_vm2, %v4215_v6  ;;  %v1239_v30 = vpop.f32.mrf.mxu0 }
 0x147   : > { %v3518_v4 = vadd.f32 %v1236_v56, %v1148_v36  ;;  %2245 = vmatmul.msk.f32.gmra.mxu2 %vm355_vm2, %v3514_v41  ;;  %v1169_v56 = vrot.slane %v3531_v9, 1 }
 0x148   : > { %2279 = vmatmul.msk.f32.gmra.mxu3 %vm355_vm2, %v4223_v37 }
 0x149   : > { %4222 = vst [vmem:[#allocation20_spill] sm:$0xff] %v3518_v4  ;;  %2313 = vmatmul.msk.f32.gmra.mxu0 %vm355_vm2, %v3041_v3  ;;  %v3538_v4 = vsel %vm717_vm3, %v793_v35, %v794_v47  ;;  %v3543_v11 = vsel %vm272_vm1, %v1169_v56, %v1170_v31  ;;  %v796_v35 = vrot.slane %v3014_v15, 2 }
 0x14a   : > { %v923_v36 = vpop.f32.mrf.mxu2 }
 0x14b   : > { %v1079_v6 = vpop.f32.mrf.mxu3  ;;  %v993_v46 = vadd.f32 %v923_v36, %v661_v14  ;;  %v663_v33 = vpop.f32.mrf.mxu1  ;;  %v3552_v14 = vld [vmem:[%s2690_s11 + $0x190] sm:$0x3] }
 0x14c   : > { %v664_v36 = vadd.f32 %v663_v33, %v3273_v8 }
 0x14d   : > { %v1149_v52 = vadd.f32 %v1079_v6, %v993_v46  ;;  %v3560_v46 = vsel %vm717_vm3, %v794_v47, %v796_v35 }
 0x14e   : > { %2212 = vmatmul.msk.f32.gmra.mxu1 %vm355_vm2, %v4219_v1  ;;  %v1242_v53 = vpop.f32.mrf.mxu0 }
 0x14f   : > { %v3545_v3 = vadd.f32 %v1239_v30, %v1149_v52  ;;  %2246 = vmatmul.msk.f32.gmra.mxu2 %vm355_vm2, %v3538_v4  ;;  %v1172_v30 = vrot.slane %v3552_v14, 1 }
 0x150   : > { %2280 = vmatmul.msk.f32.gmra.mxu3 %vm355_vm2, %v3531_v9 }
 0x151   : > { %4225 = vst [vmem:[#allocation23_spill] sm:$0xff] %v3545_v3  ;;  %2314 = vmatmul.msk.f32.gmra.mxu0 %vm355_vm2, %v3543_v11  ;;  %v3565_v15 = vsel %vm272_vm1, %v1170_v31, %v1172_v30 }
 0x152   : > { %v926_v1 = vpop.f32.mrf.mxu2 }
 0x153   : > { %v1082_v6 = vpop.f32.mrf.mxu3  ;;  %v994_v52 = vadd.f32 %v926_v1, %v664_v36  ;;  %v666_v56 = vpop.f32.mrf.mxu1 }
 0x154   : > { %v667_v33 = vadd.f32 %v666_v56, %v3293_v5 }
 0x155   : > { %v1150_v3 = vadd.f32 %v1082_v6, %v994_v52 }
 0x156   : > { %2213 = vmatmul.msk.f32.gmra.mxu1 %vm355_vm2, %v4223_v37  ;;  %v1245_v9 = vpop.f32.mrf.mxu0 }
 0x157   : > { %v3567_v8 = vadd.f32 %v1242_v53, %v1150_v3  ;;  %2247 = vmatmul.msk.f32.gmra.mxu2 %vm355_vm2, %v3560_v46 }
 0x158   : > { %2281 = vmatmul.msk.f32.gmra.mxu3 %vm355_vm2, %v3525_v38 }
 0x159   : > { %2315 = vmatmul.msk.f32.gmra.mxu0 %vm355_vm2, %v3565_v15 }
 0x15a   : > { %v929_v47 = vpop.f32.mrf.mxu2 }
 0x15b   : > { %v1085_v35 = vpop.f32.mrf.mxu3  ;;  %v995_v37 = vadd.f32 %v929_v47, %v667_v33  ;;  %v669_v36 = vpop.f32.mrf.mxu1 }
 0x15c   : > { %v670_v5 = vadd.f32 %v669_v36, %v3166_v45 }
 0x15d   : > { %v1151_v1 = vadd.f32 %v1085_v35, %v995_v37 }
 0x15e   : > { %2318 = vmatmul.msk.f32.vlgmr.msra.gmra.mxu1 %vm355_vm2, %v3076_v28  ;;  %v1248_v3 = vpop.f32.mrf.mxu0 }
 0x15f   : > { %v3578_v31 = vadd.f32 %v1245_v9, %v1151_v1  ;;  %2352 = vmatmul.msk.f32.vlgmr.msra.gmra.mxu2 %vm355_vm2, %v2881_v27 }
 0x160   : > { %2386 = vmatmul.msk.f32.vlgmr.msra.gmra.mxu3 %vm355_vm2, %v2916_v62 }
 0x161   : > { %2420 = vmatmul.msk.f32.vlgmr.msra.gmra.mxu0 %vm355_vm2, %v3101_v61 }
 0x162   : > { %v932_v53 = vpop.f32.mrf.mxu2 }
 0x163   : > { %v1088_v6 = vpop.f32.mrf.mxu3  ;;  %v996_v30 = vadd.f32 %v932_v53, %v670_v5  ;;  %v672_v52 = vpop.f32.mrf.mxu1 }
 0x164   : > { %v673_v27 = vadd.f32 %v672_v52, %v3187_v43 }
 0x165   : > { %v1152_v56 = vadd.f32 %v1088_v6, %v996_v30 }
 0x166   : > { %2319 = vmatmul.msk.f32.gmra.mxu1 %vm355_vm2, %v3088_v59  ;;  %v1251_v28 = vpop.f32.mrf.mxu0 }
 0x167   : > { %v3589_v9 = vadd.f32 %v1248_v3, %v1152_v56  ;;  %2353 = vmatmul.msk.f32.gmra.mxu2 %vm355_vm2, %v2884_v29 }
 0x168   : > { %2387 = vmatmul.msk.f32.gmra.mxu3 %vm355_vm2, %v2972_v25 }
 0x169   : > { %2421 = vmatmul.msk.f32.gmra.mxu0 %vm355_vm2, %v3113_v44 }
 0x16a   : > { %v935_v62 = vpop.f32.mrf.mxu2 }
 0x16b   : > { %v1091_v45 = vpop.f32.mrf.mxu3  ;;  %v997_v33 = vadd.f32 %v935_v62, %v673_v27  ;;  %v675_v47 = vpop.f32.mrf.mxu1 }
 0x16c   : > { %v676_v29 = vadd.f32 %v675_v47, %v3207_v40  ;;  %v2505_v47 = vld [vmem:[%s2690_s11 + $0x68] sm:$0xff] }
 0x16d   : > { %v1153_v35 = vadd.f32 %v1091_v45, %v997_v33 }
 0x16e   : > { %2320 = vmatmul.msk.f32.gmra.mxu1 %vm355_vm2, %v3101_v61  ;;  %v1254_v59 = vpop.f32.mrf.mxu0 }
 0x16f   : > { %v3600_v37 = vadd.f32 %v1251_v28, %v1153_v35  ;;  %2354 = vmatmul.msk.f32.gmra.mxu2 %vm355_vm2, %v2981_v60 }
 0x170   : > { %2388 = vmatmul.msk.f32.gmra.mxu3 %vm355_vm2, %v3019_v12 }
 0x171   : > { %2422 = vmatmul.msk.f32.gmra.mxu0 %vm355_vm2, %v3126_v63 }
 0x172   : > { %v938_v25 = vpop.f32.mrf.mxu2 }
 0x173   : > { %v1094_v43 = vpop.f32.mrf.mxu3  ;;  %v998_v36 = vadd.f32 %v938_v25, %v676_v29  ;;  %v678_v1 = vpop.f32.mrf.mxu1 }
 0x174   : > { %v679_v12 = vadd.f32 %v678_v1, %v3228_v16  ;;  %v4226_v16 = vld [vmem:[#allocation37_spill] sm:$0xff] }
 0x175   : > { %v1154_v3 = vadd.f32 %v1094_v43, %v998_v36 }
 0x176   : > { %2321 = vmatmul.msk.f32.gmra.mxu1 %vm355_vm2, %v3113_v44  ;;  %v1257_v61 = vpop.f32.mrf.mxu0 }
 0x177   : > { %v3611_v5 = vadd.f32 %v1254_v59, %v1154_v3  ;;  %2355 = vmatmul.msk.f32.gmra.mxu2 %vm355_vm2, %v2984_v32  ;;  %v2504_v32 = vld [vmem:[%s2690_s11 + $0x60] sm:$0xff]  ;;  %v4229_v59 = vld [vmem:[#allocation39_spill] sm:$0xff] }
 0x178   : > { %2389 = vmatmul.msk.f32.gmra.mxu3 %vm355_vm2, %v3046_v24 }
 0x179   : > { %2423 = vmatmul.msk.f32.gmra.mxu0 %vm355_vm2, %v3138_v55 }
 0x17a   : > { %v941_v60 = vpop.f32.mrf.mxu2 }
 0x17b   : > { %v1097_v40 = vpop.f32.mrf.mxu3  ;;  %v999_v53 = vadd.f32 %v941_v60, %v679_v12  ;;  %v681_v6 = vpop.f32.mrf.mxu1  ;;  %v4230_v12 = vld [vmem:[#allocation15_spill] sm:$0xff] }
 0x17c   : > { %v682_v24 = vadd.f32 %v681_v6, %v3248_v42  ;;  %v4228_v42 = vld [vmem:[#allocation48_spill] sm:$0xff]  ;;  %v4231_v60 = vld [vmem:[#allocation51_spill] sm:$0xff] }
 0x17d   : > { %v1155_v30 = vadd.f32 %v1097_v40, %v999_v53  ;;  %v4232_v53 = vld [vmem:[#allocation41_spill] sm:$0xff] }
 0x17e   : > { %2322 = vmatmul.msk.f32.gmra.mxu1 %vm355_vm2, %v3126_v63  ;;  %v1260_v44 = vpop.f32.mrf.mxu0 }
 0x17f   : > { %v3622_v52 = vadd.f32 %v1257_v61, %v1155_v30  ;;  %2356 = vmatmul.msk.f32.gmra.mxu2 %vm355_vm2, %v2504_v32  ;;  %v2506_v61 = vld [vmem:[%s2690_s11 + $0x78] sm:$0xff] }
 0x180   : > { %2390 = vmatmul.msk.f32.gmra.mxu3 %vm355_vm2, %v2723_v19  ;;  %v4227_v19 = vld [vmem:[#allocation10_spill] sm:$0xff] }
 0x181   : > { %2424 = vmatmul.msk.f32.gmra.mxu0 %vm355_vm2, %v4226_v16 }
 0x182   : > { %v944_v56 = vpop.f32.mrf.mxu2 }
 0x183   : > { %v1100_v28 = vpop.f32.mrf.mxu3  ;;  %v1000_v27 = vadd.f32 %v944_v56, %v682_v24  ;;  %v684_v62 = vpop.f32.mrf.mxu1 }
 0x184   : > { %v685_v35 = vadd.f32 %v684_v62, %v4228_v42  ;;  %v4234_v62 = vld [vmem:[#allocation54_spill] sm:$0xff] }
 0x185   : > { %v1156_v63 = vadd.f32 %v1100_v28, %v1000_v27  ;;  %v2507_v28 = vld [vmem:[%s2690_s11 + $0x80] sm:$0xff]  ;;  %v4233_v27 = vld [vmem:[#allocation18_spill] sm:$0xff] }
 0x186   : > { %2323 = vmatmul.msk.f32.gmra.mxu1 %vm355_vm2, %v3138_v55  ;;  %v1263_v45 = vpop.f32.mrf.mxu0 }
 0x187   : > { %v3633_v33 = vadd.f32 %v1260_v44, %v1156_v63  ;;  %2357 = vmatmul.msk.f32.gmra.mxu2 %vm355_vm2, %v2505_v47 }
 0x188   : > { %2391 = vmatmul.msk.f32.gmra.mxu3 %vm355_vm2, %v4227_v19 }
 0x189   : > { %2425 = vmatmul.msk.f32.gmra.mxu0 %vm355_vm2, %v4229_v59 }
 0x18a   : > { %v947_v29 = vpop.f32.mrf.mxu2 }
 0x18b   : > { %v1103_v25 = vpop.f32.mrf.mxu3  ;;  %v1001_v43 = vadd.f32 %v947_v29, %v685_v35  ;;  %v687_v36 = vpop.f32.mrf.mxu1 }
 0x18c   : > { %v688_v40 = vadd.f32 %v687_v36, %v4231_v60  ;;  %v4236_v36 = vld [vmem:[#allocation22_spill] sm:$0xff] }
 0x18d   : > { %v1157_v55 = vadd.f32 %v1103_v25, %v1001_v43  ;;  %v2508_v43 = vld [vmem:[%s2690_s11 + $0x90] sm:$0xff] }
 0x18e   : > { %2324 = vmatmul.msk.f32.gmra.mxu1 %vm355_vm2, %v4226_v16  ;;  %v1266_v1 = vpop.f32.mrf.mxu0 }
 0x18f   : > { %v3644_v3 = vadd.f32 %v1263_v45, %v1157_v55  ;;  %2358 = vmatmul.msk.f32.gmra.mxu2 %vm355_vm2, %v2506_v61  ;;  %v4235_v45 = vld [vmem:[#allocation43_spill] sm:$0xff]  ;;  %v4237_v55 = vld [vmem:[#allocation38_spill] sm:$0xff]  ;;  %v4238_v61 = vld [vmem:[#allocation45_spill] sm:$0xff] }
 0x190   : > { %2392 = vmatmul.msk.f32.gmra.mxu3 %vm355_vm2, %v4230_v12 }
 0x191   : > { %2426 = vmatmul.msk.f32.gmra.mxu0 %vm355_vm2, %v4232_v53 }
 0x192   : > { %v950_v6 = vpop.f32.mrf.mxu2 }
 0x193   : > { %v1106_v30 = vpop.f32.mrf.mxu3  ;;  %v1002_v44 = vadd.f32 %v950_v6, %v688_v40  ;;  %v690_v32 = vpop.f32.mrf.mxu1 }
 0x194   : > { %v691_v63 = vadd.f32 %v690_v32, %v4234_v62  ;;  %v2509_v32 = vld [vmem:[%s2690_s11 + $0x98] sm:$0xff] }
 0x195   : > { %v1158_v24 = vadd.f32 %v1106_v30, %v1002_v44 }
 0x196   : > { %2325 = vmatmul.msk.f32.gmra.mxu1 %vm355_vm2, %v4229_v59  ;;  %v1269_v16 = vpop.f32.mrf.mxu0 }
 0x197   : > { %v3655_v56 = vadd.f32 %v1266_v1, %v1158_v24  ;;  %2359 = vmatmul.msk.f32.gmra.mxu2 %vm355_vm2, %v2507_v28  ;;  %v4239_v24 = vld [vmem:[#allocation26_spill] sm:$0xff] }
 0x198   : > { %2393 = vmatmul.msk.f32.gmra.mxu3 %vm355_vm2, %v4233_v27  ;;  %v4241_v27 = vld [vmem:[#allocation47_spill] sm:$0xff] }
 0x199   : > { %2427 = vmatmul.msk.f32.gmra.mxu0 %vm355_vm2, %v4235_v45 }
 0x19a   : > { %v953_v47 = vpop.f32.mrf.mxu2 }
 0x19b   : > { %v1109_v19 = vpop.f32.mrf.mxu3  ;;  %v1003_v42 = vadd.f32 %v953_v47, %v691_v63  ;;  %v693_v35 = vpop.f32.mrf.mxu1 }
 0x19c   : > { %v694_v1 = vadd.f32 %v693_v35, %v4237_v55  ;;  %v4244_v55 = vld [vmem:[#allocation50_spill] sm:$0xff] }
 0x19d   : > { %v1159_v59 = vadd.f32 %v1109_v19, %v1003_v42 }
 0x19e   : > { %2326 = vmatmul.msk.f32.gmra.mxu1 %vm355_vm2, %v4232_v53  ;;  %v1272_v29 = vpop.f32.mrf.mxu0 }
 0x19f   : > { %v3666_v25 = vadd.f32 %v1269_v16, %v1159_v59  ;;  %2360 = vmatmul.msk.f32.gmra.mxu2 %vm355_vm2, %v2508_v43  ;;  %v4240_v16 = vld [vmem:[#allocation40_spill] sm:$0xff]  ;;  %v2510_v59 = vld [vmem:[%s2690_s11 + $0xa8] sm:$0xff] }
 0x1a0   : > { %2394 = vmatmul.msk.f32.gmra.mxu3 %vm355_vm2, %v4236_v36  ;;  %v4243_v43 = vld [vmem:[#allocation42_spill] sm:$0xff] }
 0x1a1   : > { %2428 = vmatmul.msk.f32.gmra.mxu0 %vm355_vm2, %v4238_v61 }
 0x1a2   : > { %v956_v12 = vpop.f32.mrf.mxu2 }
 0x1a3   : > { %v1112_v60 = vpop.f32.mrf.mxu3  ;;  %v1004_v40 = vadd.f32 %v956_v12, %v694_v1  ;;  %v696_v6 = vpop.f32.mrf.mxu1 }
 0x1a4   : > { %v697_v28 = vadd.f32 %v696_v6, %v4240_v16 }
 0x1a5   : > { %v1160_v53 = vadd.f32 %v1112_v60, %v1004_v40 }
 0x1a6   : > { %2327 = vmatmul.msk.f32.gmra.mxu1 %vm355_vm2, %v4235_v45  ;;  %v1275_v30 = vpop.f32.mrf.mxu0 }
 0x1a7   : > { %v3677_v44 = vadd.f32 %v1272_v29, %v1160_v53  ;;  %2361 = vmatmul.msk.f32.gmra.mxu2 %vm355_vm2, %v2509_v32  ;;  %v4242_v29 = vld [vmem:[#allocation31_spill] sm:$0xff] }
 0x1a8   : > { %2395 = vmatmul.msk.f32.gmra.mxu3 %vm355_vm2, %v4239_v24  ;;  %v4245_v32 = vld [vmem:[#allocation35_spill] sm:$0xff]  ;;  %v4246_v24 = vld [vmem:[#allocation44_spill] sm:$0xff] }
 0x1a9   : > { %2429 = vmatmul.msk.f32.gmra.mxu0 %vm355_vm2, %v4241_v27 }
 0x1aa   : > { %v959_v62 = vpop.f32.mrf.mxu2 }
 0x1ab   : > { %v1115_v63 = vpop.f32.mrf.mxu3  ;;  %v1005_v47 = vadd.f32 %v959_v62, %v697_v28  ;;  %v699_v19 = vpop.f32.mrf.mxu1  ;;  %v4247_v28 = vld [vmem:[#allocation53_spill] sm:$0xff] }
 0x1ac   : > { %v700_v36 = vadd.f32 %v699_v19, %v4243_v43  ;;  %v4249_v43 = vld [vmem:[#allocation46_spill] sm:$0xff] }
 0x1ad   : > { %v1161_v45 = vadd.f32 %v1115_v63, %v1005_v47 }
 0x1ae   : > { %2328 = vmatmul.msk.f32.gmra.mxu1 %vm355_vm2, %v4238_v61  ;;  %v1278_v42 = vpop.f32.mrf.mxu0 }
 0x1af   : > { %v3688_v35 = vadd.f32 %v1275_v30, %v1161_v45  ;;  %2362 = vmatmul.msk.f32.gmra.mxu2 %vm355_vm2, %v2510_v59  ;;  %v2511_v30 = vld [vmem:[%s2690_s11 + $0xb0] sm:$0xff]  ;;  %v2512_v59 = vld [vmem:[%s2690_s11 + $0xc0] sm:$0xff] }
 0x1b0   : > { %2396 = vmatmul.msk.f32.gmra.mxu3 %vm355_vm2, %v4242_v29  ;;  %v4248_v29 = vld [vmem:[#allocation7_spill] sm:$0xff] }
 0x1b1   : > { %2430 = vmatmul.msk.f32.gmra.mxu0 %vm355_vm2, %v4244_v55 }
 0x1b2   : > { %v962_v1 = vpop.f32.mrf.mxu2 }
 0x1b3   : > { %v1118_v12 = vpop.f32.mrf.mxu3  ;;  %v1006_v60 = vadd.f32 %v962_v1, %v700_v36  ;;  %v702_v40 = vpop.f32.mrf.mxu1  ;;  %v4250_v1 = vld [vmem:[#allocation56_spill] sm:$0xff] }
 0x1b4   : > { %v703_v16 = vadd.f32 %v702_v40, %v4246_v24  ;;  %v4251_v24 = vld [vmem:[#allocation11_spill] sm:$0xff] }
 0x1b5   : > { %v1162_v61 = vadd.f32 %v1118_v12, %v1006_v60 }
 0x1b6   : > { %2329 = vmatmul.msk.f32.gmra.mxu1 %vm355_vm2, %v4241_v27  ;;  %v1281_v6 = vpop.f32.mrf.mxu0 }
 0x1b7   : > { %v3699_v53 = vadd.f32 %v1278_v42, %v1162_v61  ;;  %2363 = vmatmul.msk.f32.gmra.mxu2 %vm355_vm2, %v2511_v30 }
 0x1b8   : > { %2397 = vmatmul.msk.f32.gmra.mxu3 %vm355_vm2, %v4245_v32  ;;  %v2513_v32 = vld [vmem:[%s2690_s11 + $0xc8] sm:$0xff] }
 0x1b9   : > { %2431 = vmatmul.msk.f32.gmra.mxu0 %vm355_vm2, %v4247_v28 }
 0x1ba   : > { %v965_v62 = vpop.f32.mrf.mxu2 }
 0x1bb   : > { %v1121_v63 = vpop.f32.mrf.mxu3  ;;  %v1007_v47 = vadd.f32 %v965_v62, %v703_v16  ;;  %v705_v19 = vpop.f32.mrf.mxu1  ;;  %v4252_v16 = vld [vmem:[#allocation49_spill] sm:$0xff] }
 0x1bc   : > { %v706_v36 = vadd.f32 %v705_v19, %v4249_v43  ;;  %v4253_v43 = vld [vmem:[#allocation52_spill] sm:$0xff] }
 0x1bd   : > { %v1163_v27 = vadd.f32 %v1121_v63, %v1007_v47 }
 0x1be   : > { %2330 = vmatmul.msk.f32.gmra.mxu1 %vm355_vm2, %v4244_v55  ;;  %v1284_v45 = vpop.f32.mrf.mxu0 }
 0x1bf   : > { %v3710_v42 = vadd.f32 %v1281_v6, %v1163_v27  ;;  %2364 = vmatmul.msk.f32.gmra.mxu2 %vm355_vm2, %v2512_v59 }
 0x1c0   : > { %2398 = vmatmul.msk.f32.gmra.mxu3 %vm355_vm2, %v4248_v29  ;;  %v2514_v29 = vld [vmem:[%s2690_s11 + $0xd8] sm:$0xff] }
 0x1c1   : > { %2432 = vmatmul.msk.f32.gmra.mxu0 %vm355_vm2, %v4250_v1 }
 0x1c2   : > { %v968_v12 = vpop.f32.mrf.mxu2 }
 0x1c3   : > { %v1124_v60 = vpop.f32.mrf.mxu3  ;;  %v1008_v40 = vadd.f32 %v968_v12, %v706_v36  ;;  %v708_v61 = vpop.f32.mrf.mxu1 }
 0x1c4   : > { %v709_v62 = vadd.f32 %v708_v61, %v4252_v16 }
 0x1c5   : > { %v1164_v55 = vadd.f32 %v1124_v60, %v1008_v40 }
 0x1c6   : > { %2331 = vmatmul.msk.f32.gmra.mxu1 %vm355_vm2, %v4247_v28  ;;  %v1287_v6 = vpop.f32.mrf.mxu0 }
 0x1c7   : > { %v3721_v30 = vadd.f32 %v1284_v45, %v1164_v55  ;;  %2365 = vmatmul.msk.f32.gmra.mxu2 %vm355_vm2, %v2513_v32  ;;  %v2515_v32 = vld [vmem:[%s2690_s11 + $0xe0] sm:$0xff] }
 0x1c8   : > { %2399 = vmatmul.msk.f32.gmra.mxu3 %vm355_vm2, %v4251_v24 }
 0x1c9   : > { %2433 = vmatmul.msk.f32.gmra.mxu0 %vm355_vm2, %v3328_v7 }
 0x1ca   : > { %v971_v63 = vpop.f32.mrf.mxu2 }
 0x1cb   : > { %v1127_v47 = vpop.f32.mrf.mxu3  ;;  %v1009_v19 = vadd.f32 %v971_v63, %v709_v62  ;;  %v711_v27 = vpop.f32.mrf.mxu1 }
 0x1cc   : > { %v712_v36 = vadd.f32 %v711_v27, %v4253_v43 }
 0x1cd   : > { %v1165_v28 = vadd.f32 %v1127_v47, %v1009_v19 }
 0x1ce   : > { %2332 = vmatmul.msk.f32.gmra.mxu1 %vm355_vm2, %v4250_v1  ;;  %v1290_v45 = vpop.f32.mrf.mxu0 }
 0x1cf   : > { %v3732_v59 = vadd.f32 %v1287_v6, %v1165_v28  ;;  %2366 = vmatmul.msk.f32.gmra.mxu2 %vm355_vm2, %v2514_v29  ;;  %v2516_v28 = vld [vmem:[%s2690_s11 + $0xf0] sm:$0xff] }
 0x1d0   : > { %2400 = vmatmul.msk.f32.gmra.mxu3 %vm355_vm2, %v2810_v54  ;;  %v4254_v54 = vld [vmem:[#allocation55_spill] sm:$0xff] }
 0x1d1   : > { %2434 = vmatmul.msk.f32.gmra.mxu0 %vm355_vm2, %v3344_v0 }
 0x1d2   : > { %v974_v12 = vpop.f32.mrf.mxu2 }
 0x1d3   : > { %v1130_v60 = vpop.f32.mrf.mxu3  ;;  %v1010_v40 = vadd.f32 %v974_v12, %v712_v36  ;;  %v714_v61 = vpop.f32.mrf.mxu1  ;;  %v3767_v12 = vld [vmem:[%s4058_s2] ss:$0 sm:$0xff] }
 0x1d4   : > { %v715_v24 = vadd.f32 %v714_v61, %v4254_v54 }
 0x1d5   : > { %v1166_v1 = vadd.f32 %v1130_v60, %v1010_v40  ;;  %v2517_v60 = vld [vmem:[%s2690_s11 + $0xf8] sm:$0xff] }
 0x1d6   : > { %2333 = vmatmul.msk.f32.gmra.mxu1 %vm355_vm2, %v3328_v7  ;;  %v1293_v55 = vpop.f32.mrf.mxu0 }
 0x1d7   : > { %v3743_v6 = vadd.f32 %v1290_v45, %v1166_v1  ;;  %2367 = vmatmul.msk.f32.gmra.mxu2 %vm355_vm2, %v2515_v32 }
 0x1d8   : > { %2401 = vmatmul.msk.f32.gmra.mxu3 %vm355_vm2, %v2846_v2 }
 0x1d9   : > { %2435 = vmatmul.msk.f32.gmra.mxu0 %vm355_vm2, %v3359_v23 }
 0x1da   : > { %v977_v16 = vpop.f32.mrf.mxu2 }
 0x1db   : > { %v1133_v62 = vpop.f32.mrf.mxu3  ;;  %v1011_v63 = vadd.f32 %v977_v16, %v715_v24  ;;  %v1359_v7 = vpop.f32.mrf.mxu1  ;;  %v2518_v16 = vld [vmem:[%s2690_s11 + $0x108] sm:$0xff] }
 0x1dc   : > { %v1455_v2 = vadd.f32 %v1359_v7, %v3332_v18 }
 0x1dd   : > { %v1167_v47 = vadd.f32 %v1133_v62, %v1011_v63 }
 0x1de   : > { %2334 = vmatmul.msk.f32.gmra.mxu1 %vm355_vm2, %v3344_v0  ;;  %v1834_v19 = vpop.f32.mrf.mxu0 }
 0x1df   : > { %v3754_v27 = vadd.f32 %v1293_v55, %v1167_v47  ;;  %2368 = vmatmul.msk.f32.gmra.mxu2 %vm355_vm2, %v2516_v28 }
 0x1e0   : > { %2402 = vmatmul.msk.f32.gmra.mxu3 %vm355_vm2, %v2901_v49 }
 0x1e1   : > { %2436 = vmatmul.msk.f32.gmra.mxu0 %vm355_vm2, %v3375_v26 }
 0x1e2   : > { %v1515_v45 = vpop.f32.mrf.mxu2 }
 0x1e3   : > { %v1675_v29 = vpop.f32.mrf.mxu3  ;;  %v1611_v43 = vadd.f32 %v1515_v45, %v1455_v2  ;;  %v1362_v0 = vpop.f32.mrf.mxu1 }
 0x1e4   : > { %v1456_v40 = vadd.f32 %v1362_v0, %v3348_v22 }
 0x1e5   : > { %v1771_v36 = vadd.f32 %v1675_v29, %v1611_v43  ;;  %v4255_v29 = vld [vmem:[#allocation57_spill] sm:$0xff] }
 0x1e6   : > { %2335 = vmatmul.msk.f32.gmra.mxu1 %vm355_vm2, %v3359_v23  ;;  %v1837_v49 = vpop.f32.mrf.mxu0 }
 0x1e7   : > { %v1930_v18 = vadd.f32 %v1834_v19, %v1771_v36  ;;  %2369 = vmatmul.msk.f32.gmra.mxu2 %vm355_vm2, %v2517_v60 }
 0x1e8   : > { %2403 = vmatmul.msk.f32.gmra.mxu3 %vm355_vm2, %v2946_v58 }
 0x1e9   : > { %v1966_v61 = vadd.f32 %v3767_v12, %v1930_v18  ;;  %2437 = vmatmul.msk.f32.gmra.mxu0 %vm355_vm2, %v3390_v10 }
 0x1ea   : > { %v1518_v23 = vpop.f32.mrf.mxu2 }
 0x1eb   : > { %v1678_v1 = vpop.f32.mrf.mxu3  ;;  %v1998_v55 = vmax.f32 %v1966_v61, 0.0  ;;  %v1612_v32 = vadd.f32 %v1518_v23, %v1456_v40  ;;  %v1365_v54 = vpop.f32.mrf.mxu1  ;;  %v2520_v23 = vld [vmem:[%s2690_s11 + $0x120] sm:$0xff] }
 0x1ec   : > { %v1457_v62 = vadd.f32 %v1365_v54, %v3363_v48  ;;  %v2519_v48 = vld [vmem:[%s2690_s11 + $0x110] sm:$0xff]  ;;  %v4257_v54 = vld [vmem:[#allocation5_spill] sm:$0xff] }
 0x1ed   : > { %2031 = vst.msk [vmem:[%s3781_s6] sm:$0xff] %vm2030_vm4, %v1998_v55  ;;  %v1772_v58 = vadd.f32 %v1678_v1, %v1612_v32  ;;  %v4256_v1 = vld [vmem:[#allocation24_spill] sm:$0xff] }
 0x1ee   : > { %2336 = vmatmul.msk.f32.gmra.mxu1 %vm355_vm2, %v3375_v26  ;;  %v1840_v22 = vpop.f32.mrf.mxu0 }
 0x1ef   : > { %v1931_v24 = vadd.f32 %v1837_v49, %v1772_v58  ;;  %2370 = vmatmul.msk.f32.gmra.mxu2 %vm355_vm2, %v2518_v16 }
 0x1f0   : > { %2404 = vmatmul.msk.f32.gmra.mxu3 %vm355_vm2, %v4191_v17 }
 0x1f1   : > { %v1967_v63 = vadd.f32 %v3767_v12, %v1931_v24  ;;  %2438 = vmatmul.msk.f32.gmra.mxu0 %vm355_vm2, %v3406_v57 }
 0x1f2   : > { %v1521_v7 = vpop.f32.mrf.mxu2 }
 0x1f3   : > { %v1681_v47 = vpop.f32.mrf.mxu3  ;;  %v1999_v19 = vmax.f32 %v1967_v63, 0.0  ;;  %v1613_v26 = vadd.f32 %v1521_v7, %v1457_v62  ;;  %v1368_v28 = vpop.f32.mrf.mxu1  ;;  %v2521_v7 = vld [vmem:[%s2690_s11 + $0x128] sm:$0xff] }
 0x1f4   : > { %v1458_v43 = vadd.f32 %v1368_v28, %v4255_v29 }
 0x1f5   : > { %2032 = vst.msk [vmem:[%s3781_s6 + $0x8] sm:$0xff] %vm2030_vm4, %v1999_v19  ;;  %v1773_v2 = vadd.f32 %v1681_v47, %v1613_v26  ;;  %v4258_v47 = vld [vmem:[#allocation12_spill] sm:$0xff] }
 0x1f6   : > { %2337 = vmatmul.msk.f32.gmra.mxu1 %vm355_vm2, %v3390_v10  ;;  %v1843_v17 = vpop.f32.mrf.mxu0  ;;  %v4259_v19 = vld [vmem:[#allocation32_spill] sm:$0xff] }
 0x1f7   : > { %v1932_v45 = vadd.f32 %v1840_v22, %v1773_v2  ;;  %2371 = vmatmul.msk.f32.gmra.mxu2 %vm355_vm2, %v2519_v48 }
 0x1f8   : > { %2405 = vmatmul.msk.f32.gmra.mxu3 %vm355_vm2, %v3038_v13 }
 0x1f9   : > { %v1968_v0 = vadd.f32 %v3767_v12, %v1932_v45  ;;  %2439 = vmatmul.msk.f32.gmra.mxu0 %vm355_vm2, %v3421_v51 }
 0x1fa   : > { %v1524_v36 = vpop.f32.mrf.mxu2 }
 0x1fb   : > { %v1684_v49 = vpop.f32.mrf.mxu3  ;;  %v2000_v18 = vmax.f32 %v1968_v0, 0.0  ;;  %v1614_v10 = vadd.f32 %v1524_v36, %v1458_v43  ;;  %v1371_v60 = vpop.f32.mrf.mxu1  ;;  %v2522_v36 = vld [vmem:[%s2690_s11 + $0x138] sm:$0xff] }
 0x1fc   : > { %v1459_v55 = vadd.f32 %v1371_v60, %v4256_v1  ;;  %v4261_v60 = vld [vmem:[#allocation6_spill] sm:$0xff] }
 0x1fd   : > { %2033 = vst.msk [vmem:[%s3781_s6 + $0x10] sm:$0xff] %vm2030_vm4, %v2000_v18  ;;  %v1774_v40 = vadd.f32 %v1684_v49, %v1614_v10  ;;  %v4260_v49 = vld [vmem:[#allocation28_spill] sm:$0xff] }
 0x1fe   : > { %2338 = vmatmul.msk.f32.gmra.mxu1 %vm355_vm2, %v3406_v57  ;;  %v1846_v13 = vpop.f32.mrf.mxu0 }
 0x1ff   : > { %v1933_v61 = vadd.f32 %v1843_v17, %v1774_v40  ;;  %2372 = vmatmul.msk.f32.gmra.mxu2 %vm355_vm2, %v2520_v23 }
 0x200   : > { %2406 = vmatmul.msk.f32.gmra.mxu3 %vm355_vm2, %v4197_v34 }
 0x201   : > { %v1969_v32 = vadd.f32 %v3767_v12, %v1933_v61  ;;  %2440 = vmatmul.msk.f32.gmra.mxu0 %vm355_vm2, %v4257_v54 }
 0x202   : > { %v1527_v58 = vpop.f32.mrf.mxu2 }
 0x203   : > { %v1687_v22 = vpop.f32.mrf.mxu3  ;;  %v2001_v24 = vmax.f32 %v1969_v32, 0.0  ;;  %v1615_v57 = vadd.f32 %v1527_v58, %v1459_v55  ;;  %v1374_v16 = vpop.f32.mrf.mxu1  ;;  %v4262_v58 = vld [vmem:[#allocation19_spill] sm:$0xff] }
 0x204   : > { %v1460_v26 = vadd.f32 %v1374_v16, %v4259_v19 }
 0x205   : > { %2034 = vst.msk [vmem:[%s3781_s6 + $0x18] sm:$0xff] %vm2030_vm4, %v2001_v24  ;;  %v1775_v62 = vadd.f32 %v1687_v22, %v1615_v57  ;;  %v4263_v22 = vld [vmem:[#allocation34_spill] sm:$0xff] }
 0x206   : > { %2339 = vmatmul.msk.f32.gmra.mxu1 %vm355_vm2, %v3421_v51  ;;  %v1849_v34 = vpop.f32.mrf.mxu0 }
 0x207   : > { %v1934_v63 = vadd.f32 %v1846_v13, %v1775_v62  ;;  %2373 = vmatmul.msk.f32.gmra.mxu2 %vm355_vm2, %v2521_v7 }
 0x208   : > { %2407 = vmatmul.msk.f32.gmra.mxu3 %vm355_vm2, %v4258_v47 }
 0x209   : > { %v1970_v28 = vadd.f32 %v3767_v12, %v1934_v63  ;;  %2441 = vmatmul.msk.f32.gmra.mxu0 %vm355_vm2, %v3452_v39 }
 0x20a   : > { %v1530_v2 = vpop.f32.mrf.mxu2 }
 0x20b   : > { %v1690_v17 = vpop.f32.mrf.mxu3  ;;  %v2002_v45 = vmax.f32 %v1970_v28, 0.0  ;;  %v1616_v51 = vadd.f32 %v1530_v2, %v1460_v26  ;;  %v1377_v48 = vpop.f32.mrf.mxu1  ;;  %v2524_v26 = vld [vmem:[%s2690_s11 + $0x150] sm:$0xff]  ;;  %v4264_v28 = vld [vmem:[#allocation8_spill] sm:$0xff] }
 0x20c   : > { %v1461_v18 = vadd.f32 %v1377_v48, %v4260_v49 }
 0x20d   : > { %2035 = vst.msk [vmem:[%s3781_s6 + $0x20] sm:$0xff] %vm2030_vm4, %v2002_v45  ;;  %v1776_v29 = vadd.f32 %v1690_v17, %v1616_v51  ;;  %v4265_v45 = vld [vmem:[#allocation16_spill] sm:$0xff] }
 0x20e   : > { %2340 = vmatmul.msk.f32.gmra.mxu1 %vm355_vm2, %v4257_v54  ;;  %v1852_v43 = vpop.f32.mrf.mxu0  ;;  %v2523_v54 = vld [vmem:[%s2690_s11 + $0x140] sm:$0xff] }
 0x20f   : > { %v1935_v0 = vadd.f32 %v1849_v34, %v1776_v29  ;;  %2374 = vmatmul.msk.f32.gmra.mxu2 %vm355_vm2, %v2522_v36 }
 0x210   : > { %2408 = vmatmul.msk.f32.gmra.mxu3 %vm355_vm2, %v4205_v21 }
 0x211   : > { %v1971_v10 = vadd.f32 %v3767_v12, %v1935_v0  ;;  %2442 = vmatmul.msk.f32.gmra.mxu0 %vm355_vm2, %v4261_v60 }
 0x212   : > { %v1533_v40 = vpop.f32.mrf.mxu2 }
 0x213   : > { %v1693_v13 = vpop.f32.mrf.mxu3  ;;  %v2003_v61 = vmax.f32 %v1971_v10, 0.0  ;;  %v1617_v23 = vadd.f32 %v1533_v40, %v1461_v18  ;;  %v1380_v1 = vpop.f32.mrf.mxu1  ;;  %v2525_v18 = vld [vmem:[%s2690_s11 + $0x158] sm:$0xff]  ;;  %v4266_v10 = vld [vmem:[#allocation27_spill] sm:$0xff] }
 0x214   : > { %v1462_v24 = vadd.f32 %v1380_v1, %v4263_v22  ;;  %v4268_v22 = vld [vmem:[#allocation33_spill] sm:$0xff] }
 0x215   : > { %2036 = vst.msk [vmem:[%s3781_s6 + $0x28] sm:$0xff] %vm2030_vm4, %v2003_v61  ;;  %v1777_v55 = vadd.f32 %v1693_v13, %v1617_v23 }
 0x216   : > { %2341 = vmatmul.msk.f32.gmra.mxu1 %vm355_vm2, %v3452_v39  ;;  %v1855_v21 = vpop.f32.mrf.mxu0 }
 0x217   : > { %v1936_v32 = vadd.f32 %v1852_v43, %v1777_v55  ;;  %2375 = vmatmul.msk.f32.gmra.mxu2 %vm355_vm2, %v2523_v54 }
 0x218   : > { %2409 = vmatmul.msk.f32.gmra.mxu3 %vm355_vm2, %v4262_v58  ;;  %v2526_v58 = vld [vmem:[%s2690_s11 + $0x168] sm:$0xff] }
 0x219   : > { %v1972_v57 = vadd.f32 %v3767_v12, %v1936_v32  ;;  %2443 = vmatmul.msk.f32.gmra.mxu0 %vm355_vm2, %v3483_v20 }
 0x21a   : > { %v1536_v16 = vpop.f32.mrf.mxu2 }
 0x21b   : > { %v1696_v62 = vpop.f32.mrf.mxu3  ;;  %v2004_v34 = vmax.f32 %v1972_v57, 0.0  ;;  %v1618_v39 = vadd.f32 %v1536_v16, %v1462_v24  ;;  %v1383_v63 = vpop.f32.mrf.mxu1  ;;  %v4269_v24 = vld [vmem:[#allocation9_spill] sm:$0xff] }
 0x21c   : > { %v1463_v2 = vadd.f32 %v1383_v63, %v4264_v28  ;;  %v2527_v28 = vld [vmem:[%s2690_s11 + $0x170] sm:$0xff] }
 0x21d   : > { %2037 = vst.msk [vmem:[%s3781_s6 + $0x30] sm:$0xff] %vm2030_vm4, %v2004_v34  ;;  %v1778_v7 = vadd.f32 %v1696_v62, %v1618_v39 }
 0x21e   : > { %2342 = vmatmul.msk.f32.gmra.mxu1 %vm355_vm2, %v4261_v60  ;;  %v1858_v47 = vpop.f32.mrf.mxu0  ;;  %v4267_v60 = vld [vmem:[#allocation13_spill] sm:$0xff] }
 0x21f   : > { %v1937_v19 = vadd.f32 %v1855_v21, %v1778_v7  ;;  %2376 = vmatmul.msk.f32.gmra.mxu2 %vm355_vm2, %v2524_v26 }
 0x220   : > { %2410 = vmatmul.msk.f32.gmra.mxu3 %vm355_vm2, %v4213_v50 }
 0x221   : > { %v1973_v17 = vadd.f32 %v3767_v12, %v1937_v19  ;;  %2444 = vmatmul.msk.f32.gmra.mxu0 %vm355_vm2, %v4265_v45 }
 0x222   : > { %v1539_v51 = vpop.f32.mrf.mxu2 }
 0x223   : > { %v1699_v48 = vpop.f32.mrf.mxu3  ;;  %v2005_v29 = vmax.f32 %v1973_v17, 0.0  ;;  %v1619_v43 = vadd.f32 %v1539_v51, %v1463_v2  ;;  %v1386_v0 = vpop.f32.mrf.mxu1  ;;  %v4270_v2 = vld [vmem:[#allocation36_spill] sm:$0xff]  ;;  %v4271_v17 = vld [vmem:[#allocation14_spill] sm:$0xff] }
 0x224   : > { %v1464_v40 = vadd.f32 %v1386_v0, %v4267_v60 }
 0x225   : > { %2038 = vst.msk [vmem:[%s3781_s6 + $0x38] sm:$0xff] %vm2030_vm4, %v2005_v29  ;;  %v1779_v36 = vadd.f32 %v1699_v48, %v1619_v43  ;;  %v4272_v48 = vld [vmem:[#allocation17_spill] sm:$0xff] }
 0x226   : > { %2343 = vmatmul.msk.f32.gmra.mxu1 %vm355_vm2, %v3483_v20  ;;  %v1861_v50 = vpop.f32.mrf.mxu0  ;;  %v1328_v29 = vrot.slane %v4272_v48, 2 }
 0x227   : > { %v1938_v49 = vadd.f32 %v1858_v47, %v1779_v36  ;;  %2377 = vmatmul.msk.f32.gmra.mxu2 %vm355_vm2, %v2525_v18 }
 0x228   : > { %2411 = vmatmul.msk.f32.gmra.mxu3 %vm355_vm2, %v4266_v10 }
 0x229   : > { %v1974_v13 = vadd.f32 %v3767_v12, %v1938_v49  ;;  %2445 = vmatmul.msk.f32.gmra.mxu0 %vm355_vm2, %v3514_v41 }
 0x22a   : > { %v1542_v61 = vpop.f32.mrf.mxu2 }
 0x22b   : > { %v1702_v23 = vpop.f32.mrf.mxu3  ;;  %v2006_v1 = vmax.f32 %v1974_v13, 0.0  ;;  %v1620_v20 = vadd.f32 %v1542_v61, %v1464_v40  ;;  %v1389_v55 = vpop.f32.mrf.mxu1  ;;  %v4273_v13 = vld [vmem:[#allocation20_spill] sm:$0xff] }
 0x22c   : > { %v1465_v57 = vadd.f32 %v1389_v55, %v4269_v24 }
 0x22d   : > { %2039 = vst.msk [vmem:[%s3781_s6 + $0x40] sm:$0xff] %vm2030_vm4, %v2006_v1  ;;  %v1780_v21 = vadd.f32 %v1702_v23, %v1620_v20  ;;  %v1331_v20 = vrot.slane %v3552_v14, 2 }
 0x22e   : > { %2344 = vmatmul.msk.f32.gmra.mxu1 %vm355_vm2, %v4265_v45  ;;  %v1864_v32 = vpop.f32.mrf.mxu0 }
 0x22f   : > { %v1939_v54 = vadd.f32 %v1861_v50, %v1780_v21  ;;  %2378 = vmatmul.msk.f32.gmra.mxu2 %vm355_vm2, %v2526_v58  ;;  %v220_v58 = vld [vmem:[%s2690_s11 + $0x198] sm:$0xff] }
 0x230   : > { %2412 = vmatmul.msk.f32.gmra.mxu3 %vm355_vm2, %v4268_v22  ;;  %v221_v22 = vld [vmem:[%s2690_s11 + $0x1a0] sm:$0xff]  ;;  %v1644_v14 = vrot.slane %v220_v58, 1 }
 0x231   : > { %v1975_v16 = vadd.f32 %v3767_v12, %v1939_v54  ;;  %2446 = vmatmul.msk.f32.gmra.mxu0 %vm355_vm2, %v3538_v4 }
 0x232   : > { %v1545_v62 = vpop.f32.mrf.mxu2 }
 0x233   : > { %v1705_v34 = vpop.f32.mrf.mxu3  ;;  %v2007_v39 = vmax.f32 %v1975_v16, 0.0  ;;  %v1621_v63 = vadd.f32 %v1545_v62, %v1465_v57  ;;  %v1392_v7 = vpop.f32.mrf.mxu1  ;;  %v1645_v16 = vrot.slane %v221_v22, 1  ;;  %v4274_v62 = vld [vmem:[#allocation23_spill] sm:$0xff] }
 0x234   : > { %v1466_v45 = vadd.f32 %v1392_v7, %v4271_v17  ;;  %v1803_v7 = vrot.slane %v220_v58, 2 }
 0x235   : > { %2040 = vst.msk [vmem:[%s3781_s6 + $0x48] sm:$0xff] %vm2030_vm4, %v2007_v39  ;;  %v1781_v47 = vadd.f32 %v1705_v34, %v1621_v63 }
 0x236   : > { %2345 = vmatmul.msk.f32.gmra.mxu1 %vm355_vm2, %v3514_v41  ;;  %v1867_v19 = vpop.f32.mrf.mxu0  ;;  %v1329_v41 = vrot.slane %v3525_v38, 2 }
 0x237   : > { %v1940_v26 = vadd.f32 %v1864_v32, %v1781_v47  ;;  %2379 = vmatmul.msk.f32.gmra.mxu2 %vm355_vm2, %v2527_v28  ;;  %v1804_v47 = vrot.slane %v221_v22, 2 }
 0x238   : > { %2413 = vmatmul.msk.f32.gmra.mxu3 %vm355_vm2, %v4270_v2  ;;  %v1330_v60 = vsel %vm717_vm3, %v1328_v29, %v1329_v41  ;;  %v1332_v24 = vsel %vm717_vm3, %v1329_v41, %v1331_v20  ;;  %v222_v2 = vld [vmem:[%s2690_s11 + $0x1a8] sm:$0x3]  ;;  %s2076_s11 = sshll.u32 %s3781_s6, 4  ;;  %s2077_s11 = int_to_ptr.vmem [resolvable:$true] %s2076_s11 }
 0x239   : > { %v1976_v51 = vadd.f32 %v3767_v12, %v1940_v26  ;;  %2447 = vmatmul.msk.f32.gmra.mxu0 %vm355_vm2, %v3560_v46 }
 0x23a   : > { %v1548_v43 = vpop.f32.mrf.mxu2 }
 0x23b   : > { %v1708_v0 = vpop.f32.mrf.mxu3  ;;  %v2008_v36 = vmax.f32 %v1976_v51, 0.0  ;;  %v1622_v50 = vadd.f32 %v1548_v43, %v1466_v45  ;;  %v1395_v49 = vpop.f32.mrf.mxu1  ;;  %v1805_v45 = vsel %vm717_vm3, %v1803_v7, %v1804_v47 }
 0x23c   : > { %v1467_v61 = vadd.f32 %v1395_v49, %v4273_v13 }
 0x23d   : > { %2041 = vst.msk [vmem:[%s3781_s6 + $0x50] sm:$0xff] %vm2030_vm4, %v2008_v36  ;;  %v1782_v18 = vadd.f32 %v1708_v0, %v1622_v50  ;;  %v1806_v36 = vrot.slane %v222_v2, 2 }
 0x23e   : > { %2346 = vmatmul.msk.f32.gmra.mxu1 %vm355_vm2, %v3538_v4  ;;  %v1870_v10 = vpop.f32.mrf.mxu0 }
 0x23f   : > { %v1941_v40 = vadd.f32 %v1867_v19, %v1782_v18  ;;  %2380 = vmatmul.msk.f32.gmra.mxu2 %vm355_vm2, %v4272_v48  ;;  %v1647_v48 = vrot.slane %v222_v2, 1 }
 0x240   : > { %2414 = vmatmul.msk.f32.gmra.mxu3 %vm355_vm2, %v3543_v11 }
 0x241   : > { %v1977_v23 = vadd.f32 %v3767_v12, %v1941_v40  ;;  %2448 = vmatmul.msk.f32.gmra.mxu0 %vm355_vm2, %v1330_v60 }
 0x242   : > { %v1551_v1 = vpop.f32.mrf.mxu2 }
 0x243   : > { %v1711_v4 = vpop.f32.mrf.mxu3  ;;  %v2009_v55 = vmax.f32 %v1977_v23, 0.0  ;;  %v1623_v21 = vadd.f32 %v1551_v1, %v1467_v61  ;;  %v1398_v32 = vpop.f32.mrf.mxu1 }
 0x244   : > { %v1468_v34 = vadd.f32 %v1398_v32, %v4274_v62 }
 0x245   : > { %2042 = vst.msk [vmem:[%s3781_s6 + $0x58] sm:$0xff] %vm2030_vm4, %v2009_v55  ;;  %v1783_v54 = vadd.f32 %v1711_v4, %v1623_v21 }
 0x246   : > { %2347 = vmatmul.msk.f32.gmra.mxu1 %vm355_vm2, %v3560_v46  ;;  %v1873_v11 = vpop.f32.mrf.mxu0 }
 0x247   : > { %v1942_v57 = vadd.f32 %v1870_v10, %v1783_v54  ;;  %2381 = vmatmul.msk.f32.gmra.mxu2 %vm355_vm2, %v3525_v38  ;;  %v1646_v38 = vsel %vm272_vm1, %v1644_v14, %v1645_v16  ;;  %v1648_v10 = vsel %vm272_vm1, %v1645_v16, %v1647_v48 }
 0x248   : > { %2415 = vmatmul.msk.f32.gmra.mxu3 %vm355_vm2, %v3565_v15 }
 0x249   : > { %v1978_v39 = vadd.f32 %v3767_v12, %v1942_v57  ;;  %2449 = vmatmul.msk.f32.gmra.mxu0 %vm355_vm2, %v1332_v24 }
 0x24a   : > { %v1554_v46 = vpop.f32.mrf.mxu2 }
 0x24b   : > { %v1714_v63 = vpop.f32.mrf.mxu3  ;;  %v2010_v19 = vmax.f32 %v1978_v39, 0.0  ;;  %v1624_v26 = vadd.f32 %v1554_v46, %v1468_v34  ;;  %v1401_v28 = vpop.f32.mrf.mxu1 }
 0x24c   : > { %v1469_v29 = vadd.f32 %v1401_v28, %v3567_v8  ;;  %v1807_v8 = vsel %vm717_vm3, %v1804_v47, %v1806_v36 }
 0x24d   : > { %2043 = vst.msk [vmem:[%s3781_s6 + $0x60] sm:$0xff] %vm2030_vm4, %v2010_v19  ;;  %v1784_v15 = vadd.f32 %v1714_v63, %v1624_v26 }
 0x24e   : > { %2348 = vmatmul.msk.f32.gmra.mxu1 %vm355_vm2, %v1330_v60  ;;  %v1876_v17 = vpop.f32.mrf.mxu0 }
 0x24f   : > { %v1943_v51 = vadd.f32 %v1873_v11, %v1784_v15  ;;  %2382 = vmatmul.msk.f32.gmra.mxu2 %vm355_vm2, %v220_v58 }
 0x250   : > { %2416 = vmatmul.msk.f32.gmra.mxu3 %vm355_vm2, %v1646_v38 }
 0x251   : > { %v1979_v41 = vadd.f32 %v3767_v12, %v1943_v51  ;;  %2450 = vmatmul.msk.f32.gmra.mxu0 %vm355_vm2, %v1805_v45 }
 0x252   : > { %v1557_v43 = vpop.f32.mrf.mxu2 }
 0x253   : > { %v1717_v0 = vpop.f32.mrf.mxu3  ;;  %v2011_v50 = vmax.f32 %v1979_v41, 0.0  ;;  %v1625_v49 = vadd.f32 %v1557_v43, %v1469_v29  ;;  %v1404_v18 = vpop.f32.mrf.mxu1 }
 0x254   : > { %v1470_v61 = vadd.f32 %v1404_v18, %v3578_v31 }
 0x255   : > { %2044 = vst.msk [vmem:[%s3781_s6 + $0x68] sm:$0xff] %vm2030_vm4, %v2011_v50  ;;  %v1785_v60 = vadd.f32 %v1717_v0, %v1625_v49 }
 0x256   : > { %2349 = vmatmul.msk.f32.gmra.mxu1 %vm355_vm2, %v1332_v24  ;;  %v1879_v40 = vpop.f32.mrf.mxu0 }
 0x257   : > { %v1944_v13 = vadd.f32 %v1876_v17, %v1785_v60  ;;  %2383 = vmatmul.msk.f32.gmra.mxu2 %vm355_vm2, %v221_v22 }
 0x258   : > { %2417 = vmatmul.msk.f32.gmra.mxu3 %vm355_vm2, %v1648_v10 }
 0x259   : > { %v1980_v23 = vadd.f32 %v3767_v12, %v1944_v13  ;;  %2451 = vmatmul.msk.f32.gmra.mxu0 %vm355_vm2, %v1807_v8 }
 0x25a   : > { %v1560_v1 = vpop.f32.mrf.mxu2 }
 0x25b   : > { %v1720_v4 = vpop.f32.mrf.mxu3  ;;  %v2012_v20 = vmax.f32 %v1980_v23, 0.0  ;;  %v1626_v55 = vadd.f32 %v1560_v1, %v1470_v61  ;;  %v1407_v21 = vpop.f32.mrf.mxu1 }
 0x25c   : > { %v1471_v22 = vadd.f32 %v1407_v21, %v3589_v9 }
 0x25d   : > { %2045 = vst.msk [vmem:[%s3781_s6 + $0x70] sm:$0xff] %vm2030_vm4, %v2012_v20  ;;  %v1786_v32 = vadd.f32 %v1720_v4, %v1626_v55 }
 0x25e   : > { %v1882_v54 = vpop.f32.mrf.mxu0 }
 0x25f   : > { %v1945_v58 = vadd.f32 %v1879_v40, %v1786_v32 }
 0x261   : > { %v1981_v11 = vadd.f32 %v3767_v12, %v1945_v58 }
 0x262   : > { %v1563_v31 = vpop.f32.mrf.mxu2 }
 0x263   : > { %v1723_v24 = vpop.f32.mrf.mxu3  ;;  %v2013_v57 = vmax.f32 %v1981_v11, 0.0  ;;  %v1627_v14 = vadd.f32 %v1563_v31, %v1471_v22  ;;  %v1410_v16 = vpop.f32.mrf.mxu1 }
 0x264   : > { %v1472_v46 = vadd.f32 %v1410_v16, %v3600_v37 }
 0x265   : > { %2046 = vst.msk [vmem:[%s3781_s6 + $0x78] sm:$0xff] %vm2030_vm4, %v2013_v57  ;;  %v1787_v62 = vadd.f32 %v1723_v24, %v1627_v14 }
 0x266   : > { %v1885_v34 = vpop.f32.mrf.mxu0 }
 0x267   : > { %v1946_v39 = vadd.f32 %v1882_v54, %v1787_v62 }
 0x269   : > { %v1982_v63 = vadd.f32 %v3767_v12, %v1946_v39 }
 0x26a   : > { %v1566_v7 = vpop.f32.mrf.mxu2 }
 0x26b   : > { %v1726_v9 = vpop.f32.mrf.mxu3  ;;  %v2014_v47 = vmax.f32 %v1982_v63, 0.0  ;;  %v1628_v19 = vadd.f32 %v1566_v7, %v1472_v46  ;;  %v1413_v26 = vpop.f32.mrf.mxu1 }
 0x26c   : > { %v1473_v2 = vadd.f32 %v1413_v26, %v3611_v5 }
 0x26d   : > { %2047 = vst.msk [vmem:[%s3781_s6 + $0x80] sm:$0xff] %vm2030_vm4, %v2014_v47  ;;  %v1788_v28 = vadd.f32 %v1726_v9, %v1628_v19 }
 0x26e   : > { %v1888_v38 = vpop.f32.mrf.mxu0 }
 0x26f   : > { %v1947_v15 = vadd.f32 %v1885_v34, %v1788_v28 }
 0x271   : > { %v1983_v17 = vadd.f32 %v3767_v12, %v1947_v15 }
 0x272   : > { %v1569_v45 = vpop.f32.mrf.mxu2 }
 0x273   : > { %v1729_v37 = vpop.f32.mrf.mxu3  ;;  %v2015_v51 = vmax.f32 %v1983_v17, 0.0  ;;  %v1629_v48 = vadd.f32 %v1569_v45, %v1473_v2  ;;  %v1416_v29 = vpop.f32.mrf.mxu1 }
 0x274   : > { %v1474_v36 = vadd.f32 %v1416_v29, %v3622_v52 }
 0x275   : > { %2048 = vst.msk [vmem:[%s3781_s6 + $0x88] sm:$0xff] %vm2030_vm4, %v2015_v51  ;;  %v1789_v41 = vadd.f32 %v1729_v37, %v1629_v48 }
 0x276   : > { %v1891_v43 = vpop.f32.mrf.mxu0 }
 0x277   : > { %v1948_v0 = vadd.f32 %v1888_v38, %v1789_v41 }
 0x279   : > { %v1984_v50 = vadd.f32 %v3767_v12, %v1948_v0 }
 0x27a   : > { %v1572_v49 = vpop.f32.mrf.mxu2 }
 0x27b   : > { %v1732_v5 = vpop.f32.mrf.mxu3  ;;  %v2016_v18 = vmax.f32 %v1984_v50, 0.0  ;;  %v1630_v10 = vadd.f32 %v1572_v49, %v1474_v36  ;;  %v1419_v60 = vpop.f32.mrf.mxu1 }
 0x27c   : > { %v1475_v61 = vadd.f32 %v1419_v60, %v3633_v33 }
 0x27d   : > { %2049 = vst.msk [vmem:[%s3781_s6 + $0x90] sm:$0xff] %vm2030_vm4, %v2016_v18  ;;  %v1790_v40 = vadd.f32 %v1732_v5, %v1630_v10 }
 0x27e   : > { %v1894_v8 = vpop.f32.mrf.mxu0 }
 0x27f   : > { %v1949_v13 = vadd.f32 %v1891_v43, %v1790_v40 }
 0x281   : > { %v1985_v23 = vadd.f32 %v3767_v12, %v1949_v13 }
 0x282   : > { %v1575_v1 = vpop.f32.mrf.mxu2 }
 0x283   : > { %v1735_v52 = vpop.f32.mrf.mxu3  ;;  %v2017_v4 = vmax.f32 %v1985_v23, 0.0  ;;  %v1631_v20 = vadd.f32 %v1575_v1, %v1475_v61  ;;  %v1422_v55 = vpop.f32.mrf.mxu1 }
 0x284   : > { %v1476_v58 = vadd.f32 %v1422_v55, %v3644_v3 }
 0x285   : > { %2050 = vst.msk [vmem:[%s3781_s6 + $0x98] sm:$0xff] %vm2030_vm4, %v2017_v4  ;;  %v1791_v21 = vadd.f32 %v1735_v52, %v1631_v20 }
 0x286   : > { %v1897_v32 = vpop.f32.mrf.mxu0 }
 0x287   : > { %v1950_v54 = vadd.f32 %v1894_v8, %v1791_v21 }
 0x289   : > { %v1986_v22 = vadd.f32 %v3767_v12, %v1950_v54 }
 0x28a   : > { %v1578_v11 = vpop.f32.mrf.mxu2 }
 0x28b   : > { %v1738_v33 = vpop.f32.mrf.mxu3  ;;  %v2018_v31 = vmax.f32 %v1986_v22, 0.0  ;;  %v1632_v24 = vadd.f32 %v1578_v11, %v1476_v58  ;;  %v1425_v57 = vpop.f32.mrf.mxu1 }
 0x28c   : > { %v1477_v34 = vadd.f32 %v1425_v57, %v3655_v56 }
 0x28d   : > { %2051 = vst.msk [vmem:[%s3781_s6 + $0xa0] sm:$0xff] %vm2030_vm4, %v2018_v31  ;;  %v1792_v14 = vadd.f32 %v1738_v33, %v1632_v24 }
 0x28e   : > { %v1900_v16 = vpop.f32.mrf.mxu0 }
 0x28f   : > { %v1951_v62 = vadd.f32 %v1897_v32, %v1792_v14 }
 0x291   : > { %v1987_v39 = vadd.f32 %v3767_v12, %v1951_v62 }
 0x292   : > { %v1581_v46 = vpop.f32.mrf.mxu2 }
 0x293   : > { %v1741_v3 = vpop.f32.mrf.mxu3  ;;  %v2019_v63 = vmax.f32 %v1987_v39, 0.0  ;;  %v1633_v7 = vadd.f32 %v1581_v46, %v1477_v34  ;;  %v1428_v9 = vpop.f32.mrf.mxu1 }
 0x294   : > { %v1478_v28 = vadd.f32 %v1428_v9, %v3666_v25 }
 0x295   : > { %2052 = vst.msk [vmem:[%s3781_s6 + $0xa8] sm:$0xff] %vm2030_vm4, %v2019_v63  ;;  %v1793_v47 = vadd.f32 %v1741_v3, %v1633_v7 }
 0x296   : > { %v1903_v19 = vpop.f32.mrf.mxu0 }
 0x297   : > { %v1952_v26 = vadd.f32 %v1900_v16, %v1793_v47 }
 0x299   : > { %v1988_v38 = vadd.f32 %v3767_v12, %v1952_v26 }
 0x29a   : > { %v1584_v15 = vpop.f32.mrf.mxu2 }
 0x29b   : > { %v1744_v56 = vpop.f32.mrf.mxu3  ;;  %v2020_v2 = vmax.f32 %v1988_v38, 0.0  ;;  %v1634_v17 = vadd.f32 %v1584_v15, %v1478_v28  ;;  %v1431_v45 = vpop.f32.mrf.mxu1 }
 0x29c   : > { %v1479_v29 = vadd.f32 %v1431_v45, %v3677_v44 }
 0x29d   : > { %2053 = vst.msk [vmem:[%s3781_s6 + $0xb0] sm:$0xff] %vm2030_vm4, %v2020_v2  ;;  %v1794_v37 = vadd.f32 %v1744_v56, %v1634_v17 }
 0x29e   : > { %v1906_v51 = vpop.f32.mrf.mxu0 }
 0x29f   : > { %v1953_v48 = vadd.f32 %v1903_v19, %v1794_v37 }
 0x2a1   : > { %v1989_v41 = vadd.f32 %v3767_v12, %v1953_v48 }
 0x2a2   : > { %v1587_v43 = vpop.f32.mrf.mxu2 }
 0x2a3   : > { %v1747_v25 = vpop.f32.mrf.mxu3  ;;  %v2021_v0 = vmax.f32 %v1989_v41, 0.0  ;;  %v1635_v36 = vadd.f32 %v1587_v43, %v1479_v29  ;;  %v1434_v50 = vpop.f32.mrf.mxu1 }
 0x2a4   : > { %v1480_v10 = vadd.f32 %v1434_v50, %v3688_v35 }
 0x2a5   : > { %2054 = vst.msk [vmem:[%s3781_s6 + $0xb8] sm:$0xff] %vm2030_vm4, %v2021_v0  ;;  %v1795_v49 = vadd.f32 %v1747_v25, %v1635_v36 }
 0x2a6   : > { %v1909_v5 = vpop.f32.mrf.mxu0 }
 0x2a7   : > { %v1954_v18 = vadd.f32 %v1906_v51, %v1795_v49 }
 0x2a9   : > { %v1990_v60 = vadd.f32 %v3767_v12, %v1954_v18 }
 0x2aa   : > { %v1590_v40 = vpop.f32.mrf.mxu2 }
 0x2ab   : > { %v1750_v44 = vpop.f32.mrf.mxu3  ;;  %v2022_v8 = vmax.f32 %v1990_v60, 0.0  ;;  %v1636_v13 = vadd.f32 %v1590_v40, %v1480_v10  ;;  %v1437_v61 = vpop.f32.mrf.mxu1 }
 0x2ac   : > { %v1481_v4 = vadd.f32 %v1437_v61, %v3699_v53 }
 0x2ad   : > { %2055 = vst.msk [vmem:[%s3781_s6 + $0xc0] sm:$0xff] %vm2030_vm4, %v2022_v8  ;;  %v1796_v23 = vadd.f32 %v1750_v44, %v1636_v13 }
 0x2ae   : > { %v1912_v1 = vpop.f32.mrf.mxu0 }
 0x2af   : > { %v1955_v52 = vadd.f32 %v1909_v5, %v1796_v23 }
 0x2b1   : > { %v1991_v20 = vadd.f32 %v3767_v12, %v1955_v52 }
 0x2b2   : > { %v1593_v55 = vpop.f32.mrf.mxu2 }
 0x2b3   : > { %v1753_v35 = vpop.f32.mrf.mxu3  ;;  %v2023_v21 = vmax.f32 %v1991_v20, 0.0  ;;  %v1637_v32 = vadd.f32 %v1593_v55, %v1481_v4  ;;  %v1440_v54 = vpop.f32.mrf.mxu1 }
 0x2b4   : > { %v1482_v33 = vadd.f32 %v1440_v54, %v3710_v42 }
 0x2b5   : > { %2056 = vst.msk [vmem:[%s3781_s6 + $0xc8] sm:$0xff] %vm2030_vm4, %v2023_v21  ;;  %v1797_v58 = vadd.f32 %v1753_v35, %v1637_v32 }
 0x2b6   : > { %v1915_v22 = vpop.f32.mrf.mxu0 }
 0x2b7   : > { %v1956_v11 = vadd.f32 %v1912_v1, %v1797_v58 }
 0x2b9   : > { %v1992_v31 = vadd.f32 %v3767_v12, %v1956_v11 }
 0x2ba   : > { %v1596_v24 = vpop.f32.mrf.mxu2 }
 0x2bb   : > { %v1756_v53 = vpop.f32.mrf.mxu3  ;;  %v2024_v57 = vmax.f32 %v1992_v31, 0.0  ;;  %v1638_v14 = vadd.f32 %v1596_v24, %v1482_v33  ;;  %v1443_v16 = vpop.f32.mrf.mxu1 }
 0x2bc   : > { %v1483_v46 = vadd.f32 %v1443_v16, %v3721_v30 }
 0x2bd   : > { %2057 = vst.msk [vmem:[%s3781_s6 + $0xd0] sm:$0xff] %vm2030_vm4, %v2024_v57  ;;  %v1798_v62 = vadd.f32 %v1756_v53, %v1638_v14 }
 0x2be   : > { %v1918_v34 = vpop.f32.mrf.mxu0 }
 0x2bf   : > { %v1957_v39 = vadd.f32 %v1915_v22, %v1798_v62 }
 0x2c1   : > { %v1993_v3 = vadd.f32 %v3767_v12, %v1957_v39 }
 0x2c2   : > { %v1599_v63 = vpop.f32.mrf.mxu2 }
 0x2c3   : > { %v1759_v42 = vpop.f32.mrf.mxu3  ;;  %v2025_v7 = vmax.f32 %v1993_v3, 0.0  ;;  %v1639_v9 = vadd.f32 %v1599_v63, %v1483_v46  ;;  %v1446_v47 = vpop.f32.mrf.mxu1 }
 0x2c4   : > { %v1484_v38 = vadd.f32 %v1446_v47, %v3732_v59 }
 0x2c5   : > { %2058 = vst.msk [vmem:[%s3781_s6 + $0xd8] sm:$0xff] %vm2030_vm4, %v2025_v7  ;;  %v1799_v19 = vadd.f32 %v1759_v42, %v1639_v9 }
 0x2c6   : > { %v1921_v28 = vpop.f32.mrf.mxu0 }
 0x2c7   : > { %v1958_v26 = vadd.f32 %v1918_v34, %v1799_v19 }
 0x2c9   : > { %v1994_v15 = vadd.f32 %v3767_v12, %v1958_v26 }
 0x2ca   : > { %v1602_v56 = vpop.f32.mrf.mxu2 }
 0x2cb   : > { %v1762_v30 = vpop.f32.mrf.mxu3  ;;  %v2026_v2 = vmax.f32 %v1994_v15, 0.0  ;;  %v1640_v17 = vadd.f32 %v1602_v56, %v1484_v38  ;;  %v1449_v45 = vpop.f32.mrf.mxu1 }
 0x2cc   : > { %v1485_v48 = vadd.f32 %v1449_v45, %v3743_v6 }
 0x2cd   : > { %2059 = vst.msk [vmem:[%s3781_s6 + $0xe0] sm:$0xff] %vm2030_vm4, %v2026_v2  ;;  %v1800_v37 = vadd.f32 %v1762_v30, %v1640_v17 }
 0x2ce   : > { %v1924_v41 = vpop.f32.mrf.mxu0 }
 0x2cf   : > { %v1959_v51 = vadd.f32 %v1921_v28, %v1800_v37 }
 0x2d1   : > { %v1995_v29 = vadd.f32 %v3767_v12, %v1959_v51 }
 0x2d2   : > { %v1605_v43 = vpop.f32.mrf.mxu2 }
 0x2d3   : > { %v1765_v59 = vpop.f32.mrf.mxu3  ;;  %v2027_v25 = vmax.f32 %v1995_v29, 0.0  ;;  %v1641_v0 = vadd.f32 %v1605_v43, %v1485_v48  ;;  %v1452_v50 = vpop.f32.mrf.mxu1 }
 0x2d4   : > { %v1486_v5 = vadd.f32 %v1452_v50, %v3754_v27 }
 0x2d5   : > { %2060 = vst.msk [vmem:[%s3781_s6 + $0xe8] sm:$0xff] %vm2030_vm4, %v2027_v25  ;;  %v1801_v36 = vadd.f32 %v1765_v59, %v1641_v0 }
 0x2d6   : > { %v1927_v44 = vpop.f32.mrf.mxu0 }
 0x2d7   : > { %v1960_v49 = vadd.f32 %v1924_v41, %v1801_v36 }
 0x2d9   : > { %v1996_v18 = vadd.f32 %v3767_v12, %v1960_v49 }
 0x2da   : > { %v1608_v6 = vpop.f32.mrf.mxu2 }
 0x2db   : > { %v1768_v10 = vpop.f32.mrf.mxu3  ;;  %v2028_v60 = vmax.f32 %v1996_v18, 0.0  ;;  %v1642_v40 = vadd.f32 %v1608_v6, %v1486_v5 }
 0x2dd   : > { %2061 = vst.msk [vmem:[%s3781_s6 + $0xf0] sm:$0xff] %vm2030_vm4, %v2028_v60  ;;  %v1802_v8 = vadd.f32 %v1768_v10, %v1642_v40 }
 0x2df   : > { %v1961_v13 = vadd.f32 %v1927_v44, %v1802_v8 }
 0x2e1   : > { %v1997_v27 = vadd.f32 %v3767_v12, %v1961_v13 }
 0x2e3   : > { %v2029_v61 = vmax.f32 %v1997_v27, 0.0 }
 0x2e5   : > { %2062 = vst.msk [vmem:[%s3781_s6 + $0xf8] sm:$0xff] %vm2030_vm4, %v2029_v61 }
 0x2e6   : > { %2555 = shalt.err (!%p2552_p3)
}
 0x2e7   : > { %s2592_s29 = smov 128   ;;  %s2593_s30 = smov 8  }
 0x2e8   : > { %2462 = dma.vmem_to_hbm [thread:$0]  (%p2652_p5), %s2077_s11, 4096, %s2079_s17, %s2064_s16, %s2592_s29, %s2592_s29, %s2593_s30  }
 0x2e9 PF: > { %p2468_p4 = scmp.ge.s32.totalorder %s2590_s15, 2  ;;  %s2093_s4 = sand.u32 1, %s2578_s12  }
 0x2ea   : > { %s2094_s5 = scalar_lea.sflag [#allocation3], %s2093_s4 }
 0x2eb   : > { %p2465_p7 = pnand %p2468_p4, %p2656_p6 }
 0x2ed   : > { %p2466_p8 = pneg %p2465_p7 }
 0x2ef   : > { %2573 = dma.done.wait (%p2466_p8), %s2094_s5, 4096  }
 0x2f0   : > { %2575 = vsyncadd (%p2466_p8), %s2094_s5, 4294963200  ;;  %p13_p9 = scmp.ge.s32.totalorder %s2639_s18, 4   ;;  %s4275_s12 = smov %s2582_s13 }
 0x2f1   : > { %s4276_s13 = smov %s2586_s14  ;;  %s4277_s14 = smov %s2650_s21 }
 0x2f2   : > { %s4278_s15 = smov %s2639_s18  ;;  %15 = sbr.rel (!%p13_p9) target bundleno = 3 (0x3), region = 75 }
 0x2f7   :  { %2100 = vsyncpa [#allocation3], 1 }
 0x2f8   :  { %2102 = vsyncpa [#allocation3 + $0x1], 1 }

</bundles_post_ra>
